<compile_context>
chip_gen: v5e
topology: v5e:2x2
jax: 0.10.0
libtpu: 0.0.40
codegen_flags: <defaults>
</compile_context>

<pallas_src>
import jax
import jax.numpy as jnp
from jax import lax
from jax.experimental import pallas as pl
from jax.experimental.pallas import tpu as pltpu

# ----------------------------- config ---------------------------------------
VOCAB = 50          # len(word2id); table has VOCAB+1 rows (row 0 = padding, zeroed)
EMB = 32            # embedding_size
HIDDEN = 32         # hidden_size
LAYER_NUM = 1
BATCH = 2
SEQ = 8
PADV = 64           # padded vocab per direction (>= VOCAB+1); 2*PADV = 128 lanes (lane-dense)

F32 = jnp.float32


def _vmem():
    return pl.BlockSpec(memory_space=pltpu.MemorySpace.VMEM)


# --------------------------- fused forward kernel ----------------------------
def attention_model_kernel(ids_ref, table_ref, w_hh_ref, b_ref,
                           w1_ref, b1_ref, w2_ref, sel_ref, swap_ref,
                           h0_ref, c0_ref, out_ref, x_scr):
    """Fully fused AttentionModel forward.

    ids  : (S*2B, 2) int32, row r = t*2B + b (rows [quote batch ; response batch]);
           col 0 = token at time t, col 1 = token at time S-1-t.
    table: (2*PADV, 8H) precomputed emb @ W_ih; rows [0:V] feed fwd lanes, [PADV:PADV+V] bwd lanes.
    w_hh : (2H, 8H) rows [acts-on-h_fwd ; acts-on-h_bwd]; columns gate-major [i|f|o|g], each
           gate block lanes [fwd | bwd] (off-direction sub-blocks are zero).
    b    : (1, 8H)  b_ih + b_hh, same column layout.
    w1   : (2H, 4H) attention first-layer weights, column blocks [q2q | q2r | r2r | r2q].
    b1   : (1, 4H)
    w2   : (4H, 4)  attention second-layer vectors packed block-diagonally.
    sel  : (2B, S*2B) constant; sel[b, t*2B+b] = 1  (sum-over-time selector).
    swap : (S*2B, S*2B) constant; swaps quote<->response rows within each time block.
    h0,c0: (2B, 2H) initial state, rows [quote ; response], lanes [fwd | bwd].
    out  : (2B, 6H) rows [quote ; response], cols [self | cross | self+cross].
    x_scr: (S*2B, 2H) VMEM scratch for the BiLSTM outputs.
    """
    S, B, H = SEQ, BATCH, HIDDEN
    TWO_B = 2 * B

    # ---- fused embedding + input projection + direction select (one MXU matmul) ----
    ids = ids_ref[...]                                                   # (S*2B, 2) int32
    iota_v = lax.broadcasted_iota(jnp.int32, (S * TWO_B, 2 * PADV), 1)
    onehot = jnp.logical_or(ids[:, 0:1] == iota_v,
                            (ids[:, 1:2] + PADV) == iota_v).astype(F32)  # (S*2B, 2*PADV)
    gx = jnp.dot(onehot, table_ref[...],
                 preferred_element_type=F32) + b_ref[...]                # (S*2B, 8H)
    # gx row t*2B+b already has fwd-lane gates from x_t and bwd-lane gates from x_{S-1-t}.

    # ------------- 4-chain BiLSTM recurrence, statically unrolled over S ------------
    w_hh = w_hh_ref[...]                          # (2H, 8H), loaded once
    h = h0_ref[...]                               # (2B, 2H): lanes [h_fwd | h_bwd]
    c = c0_ref[...]
    for t in range(S):
        gates = gx[t * TWO_B:(t + 1) * TWO_B, :] + \
            jnp.dot(h, w_hh, preferred_element_type=F32)                 # (2B, 8H)
        sig = jax.nn.sigmoid(gates[:, 0:6 * H])   # [i | f | o] in one EUP pass
        g_g = jnp.tanh(gates[:, 6 * H:8 * H])     # g gate
        i_g = sig[:, 0:2 * H]
        f_g = sig[:, 2 * H:4 * H]
        o_g = sig[:, 4 * H:6 * H]
        c = f_g * c + i_g * g_g
        h = o_g * jnp.tanh(c)
        # forward hidden belongs to time t; backward hidden belongs to time S-1-t
        x_scr[t * TWO_B:(t + 1) * TWO_B, 0:H] = h[:, 0:H]
        x_scr[(S - 1 - t) * TWO_B:(S - t) * TWO_B, H:2 * H] = h[:, H:2 * H]

    x_flat = x_scr[...]                                                  # (S*2B, 2H)

    # -------------- all four attention MLPs as two lane-dense matmuls ---------------
    hidden = jnp.tanh(jnp.dot(x_flat, w1_ref[...],
                              preferred_element_type=F32) + b1_ref[...])  # (S*2B, 4H)
    logits = jnp.dot(hidden, w2_ref[...], preferred_element_type=F32)     # (S*2B, 4)
    # (second Linear's bias is a constant shift before softmax over S -> dropped, no-op)

    # ------------------------- softmax over S (whole-array) -------------------------
    m = jnp.max(logits, axis=(0, 1), keepdims=True)        # global scalar max (shift-invariant)
    e = jnp.exp(logits - m)                                 # (S*2B, 4)
    sel = sel_ref[...]                                      # (2B, S*2B)
    e_swap = jnp.dot(swap_ref[...], e, preferred_element_type=F32)       # quote<->response rows
    denom = jnp.dot(sel, e, preferred_element_type=F32)                  # (2B, 4)
    denom_swap = jnp.dot(sel, e_swap, preferred_element_type=F32)        # (2B, 4)
    inv = pl.reciprocal(denom, approx=True)
    inv_swap = pl.reciprocal(denom_swap, approx=True)

    # row parity masks (TWO_B is a power of two, so % TWO_B == & (TWO_B-1))
    row_q = jnp.bitwise_and(
        lax.broadcasted_iota(jnp.int32, (S * TWO_B, 1), 0), TWO_B - 1) < B
    row_q_s = lax.broadcasted_iota(jnp.int32, (TWO_B, 1), 0) < B

    # per-row unnormalized weights, columns [q2q, q2r, r2r, r2q]
    w_self_un = jnp.where(row_q, e[:, 0:1], e[:, 2:3])                   # (S*2B, 1)
    w_cross_un = jnp.where(row_q, e_swap[:, 3:4], e_swap[:, 1:2])        # (S*2B, 1)
    inv_self = jnp.where(row_q_s, inv[:, 0:1], inv[:, 2:3])              # (2B, 1)
    inv_cross = jnp.where(row_q_s, inv_swap[:, 3:4], inv_swap[:, 1:2])   # (2B, 1)

    # ------------------- pooling: two selector matmuls do all 4 sums ----------------
    pooled_self = inv_self * jnp.dot(sel, w_self_un * x_flat,
                                     preferred_element_type=F32)         # (2B, 2H)
    pooled_cross = inv_cross * jnp.dot(sel, w_cross_un * x_flat,
                                       preferred_element_type=F32)       # (2B, 2H)

    # hybrid attention: concat(self, cross, self + cross)
    feat = jnp.concatenate([pooled_self, pooled_cross, pooled_self + pooled_cross],
                           axis=-1)                                      # (2B, 6H)
    out_ref[...] = feat.astype(out_ref.dtype)


# ------------------------------ wrapper --------------------------------------
@jax.jit
def attention_model_forward(packed, X_q, X_r, q_init_state, r_init_state):
    B, S, H = BATCH, SEQ, HIDDEN
    # time-major token ids, rows [quote batch ; response batch] at every step;
    # col 0 = forward-time id, col 1 = reversed-time id (bakes the bwd reversal in).
    ids_t = jnp.transpose(jnp.concatenate([X_q, X_r], axis=0), (1, 0))   # (S, 2B)
    ids2 = jnp.stack([ids_t, ids_t[::-1]], axis=-1).reshape(S * 2 * B, 2).astype(jnp.int32)

    def pack_state(q_state, r_state, idx):
        q = q_state[idx]            # (layer_num*2, B, H): [fwd; bwd]
        r = r_state[idx]
        return jnp.concatenate(
            [jnp.concatenate([q[0], q[1]], axis=1),
             jnp.concatenate([r[0], r[1]], axis=1)], axis=0)             # (2B, 2H)

    h0 = pack_state(q_init_state, r_init_state, 0)
    c0 = pack_state(q_init_state, r_init_state, 1)

    out = pl.pallas_call(
        attention_model_kernel,
        out_shape=jax.ShapeDtypeStruct((2 * B, 6 * H), F32),
        in_specs=[_vmem() for _ in range(11)],
        out_specs=_vmem(),
        scratch_shapes=[pltpu.VMEM((S * 2 * B, 2 * H), F32)],
    )(ids2, packed['gx_table'], packed['w_hh'], packed['b'],
      packed['w1'], packed['b1'], packed['w2'], packed['sel'], packed['swap'],
      h0, c0)
    return out[:B], out[B:]


# ------------------------------ parameters -----------------------------------
def init_params(key):
    keys = iter(jax.random.split(key, 64))

    def nrm(shape, scale=0.1):
        return (scale * jax.random.normal(next(keys), shape)).astype(F32)

    params = {}
    emb = nrm((VOCAB + 1, EMB))
    params['embedding'] = emb.at[0].set(0.0)        # embedding.weight.data[0] = 0

    def lstm_dir():
        return {'w_ih': nrm((EMB, 4 * HIDDEN)),     # torch weight_ih_l0, transposed; gates [i,f,g,o]
                'w_hh': nrm((HIDDEN, 4 * HIDDEN)),  # torch weight_hh_l0, transposed
                'b_ih': nrm((4 * HIDDEN,)),
                'b_hh': nrm((4 * HIDDEN,))}

    params['lstm_fwd'] = lstm_dir()
    params['lstm_bwd'] = lstm_dir()

    def attn():
        return {'w1': nrm((2 * HIDDEN, HIDDEN)), 'b1': nrm((HIDDEN,)),
                'w2': nrm((HIDDEN, 1)), 'b2': nrm((1,))}

    for name in ('q2q', 'r2r', 'r2q', 'q2r'):
        params[name] = attn()
    return params


def pack_params(p):
    """Repack per-layer (PyTorch-style) parameters into the fused-kernel layout."""
    H = HIDDEN
    V = VOCAB + 1
    TWO_B = 2 * BATCH
    f, b = p['lstm_fwd'], p['lstm_bwd']

    def pack_gates(wf, wb):
        # per-direction gate blocks are [i, f, g, o]; repack columns to
        # [i_f i_b | f_f f_b | o_f o_b | g_f g_b] so sigmoid gates are lane-contiguous.
        def blk(w, k):
            return w[..., k * H:(k + 1) * H]
        return jnp.concatenate([blk(wf, 0), blk(wb, 0),    # i
                                blk(wf, 1), blk(wb, 1),    # f
                                blk(wf, 3), blk(wb, 3),    # o
                                blk(wf, 2), blk(wb, 2)],   # g
                               axis=-1)

    w_ih = pack_gates(f['w_ih'], b['w_ih'])                                     # (E, 8H)
    bias = pack_gates(f['b_ih'] + f['b_hh'], b['b_ih'] + b['b_hh'])[None, :]    # (1, 8H)
    w_hh = jnp.concatenate(
        [pack_gates(f['w_hh'], jnp.zeros_like(f['w_hh'])),      # rows acting on h_fwd
         pack_gates(jnp.zeros_like(b['w_hh']), b['w_hh'])],     # rows acting on h_bwd
        axis=0)                                                 # (2H, 8H) block structure

    # fused embedding + input-projection table, fwd/bwd lane split baked in
    gx_full = jnp.dot(p['embedding'], w_ih,
                      precision=jax.lax.Precision.HIGHEST)                      # (V, 8H)
    is_fwd_lane = (jnp.arange(8 * H) % (2 * H)) < H
    tab_f = jnp.where(is_fwd_lane[None, :], gx_full, 0.0)
    tab_b = jnp.where(is_fwd_lane[None, :], 0.0, gx_full)
    table = jnp.zeros((2 * PADV, 8 * H), F32)
    table = table.at[0:V].set(tab_f).at[PADV:PADV + V].set(tab_b)               # (2*PADV, 8H)

    order = ('q2q', 'q2r', 'r2r', 'r2q')
    w1 = jnp.concatenate([p[k]['w1'] for k in order], axis=1)                   # (2H, 4H)
    b1 = jnp.concatenate([p[k]['b1'] for k in order], axis=0)[None, :]          # (1, 4H)
    w2 = jnp.zeros((4 * H, 4), F32)
    for i, k in enumerate(order):
        w2 = w2.at[i * H:(i + 1) * H, i].set(p[k]['w2'][:, 0])                  # block-diag (4H, 4)
    # NOTE: the attention layers' second bias b2 is a constant shift before the softmax
    # over S, hence has zero effect on the output; it is intentionally not packed.

    rows = jnp.arange(SEQ * TWO_B)
    sel = (rows[None, :] % TWO_B == jnp.arange(TWO_B)[:, None]).astype(F32)     # (2B, S*2B)
    swap_tgt = (rows // TWO_B) * TWO_B + (rows % TWO_B + BATCH) % TWO_B
    swap = (rows[None, :] == swap_tgt[:, None]).astype(F32)                     # (S*2B, S*2B)

    return {'gx_table': table, 'w_hh': w_hh, 'b': bias,
            'w1': w1, 'b1': b1, 'w2': w2, 'sel': sel, 'swap': swap}


# ------------------------ plain-JAX reference (unfused) -----------------------
def reference_forward(p, X_q, X_r, q_init_state, r_init_state):
    """Mirror of AttentionModel.forward (hybrid 'self-cross'), structured like the PyTorch code."""
    H = HIDDEN
    HI = jax.lax.Precision.HIGHEST
    emb = p['embedding']

    def lstm_dir(x_bse, d, h0, c0):
        def step(carry, x_t):
            h, c = carry
            g = (jnp.dot(x_t, d['w_ih'], precision=HI)
                 + jnp.dot(h, d['w_hh'], precision=HI) + d['b_ih'] + d['b_hh'])
            i = jax.nn.sigmoid(g[:, :H])
            ff = jax.nn.sigmoid(g[:, H:2 * H])
            gg = jnp.tanh(g[:, 2 * H:3 * H])
            o = jax.nn.sigmoid(g[:, 3 * H:])
            c = ff * c + i * gg
            h = o * jnp.tanh(c)
            return (h, c), h
        _, hs = lax.scan(step, (h0, c0), jnp.transpose(x_bse, (1, 0, 2)))
        return jnp.transpose(hs, (1, 0, 2))                         # (B, S, H)

    def bilstm(x_bse, init):
        h0, c0 = init
        fwd = lstm_dir(x_bse, p['lstm_fwd'], h0[0], c0[0])
        bwd = lstm_dir(x_bse[:, ::-1], p['lstm_bwd'], h0[1], c0[1])[:, ::-1]
        return jnp.concatenate([fwd, bwd], axis=-1)                 # (B, S, 2H)

    qo = bilstm(jnp.take(emb, X_q, axis=0), q_init_state)
    ro = bilstm(jnp.take(emb, X_r, axis=0), r_init_state)

    def attn(layer, bilstm_outputs, attention_source):
        Bq, Sq, D = attention_source.shape
        hdn = jnp.tanh(jnp.dot(attention_source.reshape(-1, D), layer['w1'],
                               precision=HI) + layer['b1'])
        lg = (jnp.dot(hdn, layer['w2'], precision=HI) + layer['b2']).reshape(Bq, Sq)
        w = jax.nn.softmax(lg, axis=1)[:, :, None]
        return jnp.sum(w * bilstm_outputs, axis=1)

    self_q = attn(p['q2q'], qo, qo)
    self_r = attn(p['r2r'], ro, ro)
    cross_q = attn(p['r2q'], qo, ro)
    cross_r = attn(p['q2r'], ro, qo)
    q_feat = jnp.concatenate([self_q, cross_q, self_q + cross_q], axis=1)
    r_feat = jnp.concatenate([self_r, cross_r, self_r + cross_r], axis=1)
    return q_feat, r_feat


# --------------------------------- main ---------------------------------------
if __name__ == "__main__":
    # TODO(synk): nn.Dropout (eval mode -> identity) and load_pretrained_embeddings (file I/O)
    # are not represented; the embedding table is randomly initialized with row 0 zeroed.
    key = jax.random.PRNGKey(0)
    k_par, k_q, k_r = jax.random.split(key, 3)

    params = init_params(k_par)
    packed = pack_params(params)

    X_q = jax.random.randint(k_q, (BATCH, SEQ), 0, VOCAB + 1, dtype=jnp.int32)
    X_r = jax.random.randint(k_r, (BATCH, SEQ), 0, VOCAB + 1, dtype=jnp.int32)

    # init_hidden: zeros of shape (layer_num * 2, batch, hidden)
    zeros_state = jnp.zeros((LAYER_NUM * 2, BATCH, HIDDEN), dtype=F32)
    q_init_state = (zeros_state, zeros_state)
    r_init_state = (zeros_state, zeros_state)

    q_out, r_out = attention_model_forward(packed, X_q, X_r, q_init_state, r_init_state)
    jax.block_until_ready((q_out, r_out))
    assert q_out.shape == (BATCH, 6 * HIDDEN)
    assert r_out.shape == (BATCH, 6 * HIDDEN)

    # numerical check of the fused kernel against the unfused plain-JAX reference
    ref_q, ref_r = jax.jit(reference_forward)(params, X_q, X_r, q_init_state, r_init_state)
    err = max(float(jnp.max(jnp.abs(q_out - ref_q))),
              float(jnp.max(jnp.abs(r_out - ref_r))))
    assert err < 2e-2, f"kernel/reference mismatch: max abs err = {err}"

    print("KERNEL_OK")
</pallas_src>

<mosaic_0001>
module attributes {stable_mosaic.version = 11 : i64} {
  func.func @attention_model_kernel(%arg0: memref<32x2xi32, #tpu.memory_space<vmem>>, %arg1: memref<128x256xf32, #tpu.memory_space<vmem>>, %arg2: memref<64x256xf32, #tpu.memory_space<vmem>>, %arg3: memref<1x256xf32, #tpu.memory_space<vmem>>, %arg4: memref<64x128xf32, #tpu.memory_space<vmem>>, %arg5: memref<1x128xf32, #tpu.memory_space<vmem>>, %arg6: memref<128x4xf32, #tpu.memory_space<vmem>>, %arg7: memref<4x32xf32, #tpu.memory_space<vmem>>, %arg8: memref<32x32xf32, #tpu.memory_space<vmem>>, %arg9: memref<4x64xf32, #tpu.memory_space<vmem>>, %arg10: memref<4x64xf32, #tpu.memory_space<vmem>>, %arg11: memref<4x192xf32, #tpu.memory_space<vmem>>, %arg12: memref<32x64xf32, #tpu.memory_space<vmem>>) attributes {dimension_semantics = [], scalar_prefetch = 0 : i64, scratch_operands = 1 : i64, tpu.core_type = #tpu.core_type<tc>} {
    %c0 = arith.constant 0 : index
    %c0_0 = arith.constant 0 : index
    %0 = vector.load %arg0[%c0, %c0_0] : memref<32x2xi32, #tpu.memory_space<vmem>>, vector<32x2xi32>
    %1 = tpu.iota {dimensions = array<i32: 1>} : vector<32x128xi32>
    %2 = vector.extract_strided_slice %0 {offsets = [0, 0], sizes = [32, 1], strides = [1, 1]} : vector<32x2xi32> to vector<32x1xi32>
    %3 = vector.broadcast %2 : vector<32x1xi32> to vector<32x128xi32>
    %4 = arith.cmpi eq, %3, %1 : vector<32x128xi32>
    %5 = vector.extract_strided_slice %0 {offsets = [0, 1], sizes = [32, 1], strides = [1, 1]} : vector<32x2xi32> to vector<32x1xi32>
    %c64_i32 = arith.constant 64 : i32
    %6 = vector.broadcast %c64_i32 : i32 to vector<32x1xi32>
    %7 = arith.addi %5, %6 : vector<32x1xi32>
    %8 = vector.broadcast %7 : vector<32x1xi32> to vector<32x128xi32>
    %9 = arith.cmpi eq, %8, %1 : vector<32x128xi32>
    %10 = arith.ori %4, %9 : vector<32x128xi1>
    %11 = arith.extui %10 : vector<32x128xi1> to vector<32x128xi32>
    %12 = arith.sitofp %11 : vector<32x128xi32> to vector<32x128xf32>
    %c0_1 = arith.constant 0 : index
    %c0_2 = arith.constant 0 : index
    %13 = vector.load %arg1[%c0_1, %c0_2] : memref<128x256xf32, #tpu.memory_space<vmem>>, vector<128x256xf32>
    %cst = arith.constant dense<0.000000e+00> : vector<32x256xf32>
    %14 = tpu.matmul %12, %13, %cst {dimension_numbers = #tpu.dot_dimension_numbers<[1], [0], [0], [1], [0, 0, 1, 1], [], []>} : vector<32x128xf32>, vector<128x256xf32>, vector<32x256xf32> -> vector<32x256xf32>
    %c0_3 = arith.constant 0 : index
    %c0_4 = arith.constant 0 : index
    %15 = vector.load %arg3[%c0_3, %c0_4] : memref<1x256xf32, #tpu.memory_space<vmem>>, vector<1x256xf32>
    %16 = vector.broadcast %15 : vector<1x256xf32> to vector<32x256xf32>
    %17 = arith.addf %14, %16 : vector<32x256xf32>
    %c0_5 = arith.constant 0 : index
    %c0_6 = arith.constant 0 : index
    %18 = vector.load %arg2[%c0_5, %c0_6] : memref<64x256xf32, #tpu.memory_space<vmem>>, vector<64x256xf32>
    %c0_7 = arith.constant 0 : index
    %c0_8 = arith.constant 0 : index
    %19 = vector.load %arg9[%c0_7, %c0_8] : memref<4x64xf32, #tpu.memory_space<vmem>>, vector<4x64xf32>
    %c0_9 = arith.constant 0 : index
    %c0_10 = arith.constant 0 : index
    %20 = vector.load %arg10[%c0_9, %c0_10] : memref<4x64xf32, #tpu.memory_space<vmem>>, vector<4x64xf32>
    %21 = vector.extract_strided_slice %17 {offsets = [0, 0], sizes = [4, 256], strides = [1, 1]} : vector<32x256xf32> to vector<4x256xf32>
    %cst_11 = arith.constant dense<0.000000e+00> : vector<4x256xf32>
    %22 = tpu.matmul %19, %18, %cst_11 {dimension_numbers = #tpu.dot_dimension_numbers<[1], [0], [0], [1], [0, 0, 1, 1], [], []>} : vector<4x64xf32>, vector<64x256xf32>, vector<4x256xf32> -> vector<4x256xf32>
    %23 = arith.addf %21, %22 : vector<4x256xf32>
    %24 = vector.extract_strided_slice %23 {offsets = [0, 0], sizes = [4, 192], strides = [1, 1]} : vector<4x256xf32> to vector<4x192xf32>
    %25 = arith.negf %24 : vector<4x192xf32>
    %26 = math.exp %25 : vector<4x192xf32>
    %cst_12 = arith.constant 1.000000e+00 : f32
    %27 = vector.broadcast %cst_12 : f32 to vector<4x192xf32>
    %28 = arith.addf %27, %26 : vector<4x192xf32>
    %29 = arith.divf %27, %28 : vector<4x192xf32>
    %30 = vector.extract_strided_slice %23 {offsets = [0, 192], sizes = [4, 64], strides = [1, 1]} : vector<4x256xf32> to vector<4x64xf32>
    %31 = math.tanh %30 : vector<4x64xf32>
    %32 = vector.extract_strided_slice %29 {offsets = [0, 0], sizes = [4, 64], strides = [1, 1]} : vector<4x192xf32> to vector<4x64xf32>
    %33 = vector.extract_strided_slice %29 {offsets = [0, 64], sizes = [4, 64], strides = [1, 1]} : vector<4x192xf32> to vector<4x64xf32>
    %34 = vector.extract_strided_slice %29 {offsets = [0, 128], sizes = [4, 64], strides = [1, 1]} : vector<4x192xf32> to vector<4x64xf32>
    %35 = arith.mulf %33, %20 : vector<4x64xf32>
    %36 = arith.mulf %32, %31 : vector<4x64xf32>
    %37 = arith.addf %35, %36 : vector<4x64xf32>
    %38 = math.tanh %37 : vector<4x64xf32>
    %39 = arith.mulf %34, %38 : vector<4x64xf32>
    %40 = vector.extract_strided_slice %39 {offsets = [0, 0], sizes = [4, 32], strides = [1, 1]} : vector<4x64xf32> to vector<4x32xf32>
    %c0_13 = arith.constant 0 : index
    %c0_14 = arith.constant 0 : index
    %41 = vector.load %arg12[%c0_13, %c0_14] : memref<32x64xf32, #tpu.memory_space<vmem>>, vector<4x32xf32>
    tpu.vector_store %arg12[%c0_13, %c0_14], %40 {strides = array<i32>} : memref<32x64xf32, #tpu.memory_space<vmem>>, vector<4x32xf32>,
    %42 = vector.extract_strided_slice %39 {offsets = [0, 32], sizes = [4, 32], strides = [1, 1]} : vector<4x64xf32> to vector<4x32xf32>
    %c28 = arith.constant 28 : index
    %c32 = arith.constant 32 : index
    %43 = vector.load %arg12[%c28, %c32] : memref<32x64xf32, #tpu.memory_space<vmem>>, vector<4x32xf32>
    tpu.vector_store %arg12[%c28, %c32], %42 {strides = array<i32>} : memref<32x64xf32, #tpu.memory_space<vmem>>, vector<4x32xf32>,
    %44 = vector.extract_strided_slice %17 {offsets = [4, 0], sizes = [4, 256], strides = [1, 1]} : vector<32x256xf32> to vector<4x256xf32>
    %cst_15 = arith.constant dense<0.000000e+00> : vector<4x256xf32>
    %45 = tpu.matmul %39, %18, %cst_15 {dimension_numbers = #tpu.dot_dimension_numbers<[1], [0], [0], [1], [0, 0, 1, 1], [], []>} : vector<4x64xf32>, vector<64x256xf32>, vector<4x256xf32> -> vector<4x256xf32>
    %46 = arith.addf %44, %45 : vector<4x256xf32>
    %47 = vector.extract_strided_slice %46 {offsets = [0, 0], sizes = [4, 192], strides = [1, 1]} : vector<4x256xf32> to vector<4x192xf32>
    %48 = arith.negf %47 : vector<4x192xf32>
    %49 = math.exp %48 : vector<4x192xf32>
    %cst_16 = arith.constant 1.000000e+00 : f32
    %50 = vector.broadcast %cst_16 : f32 to vector<4x192xf32>
    %51 = arith.addf %50, %49 : vector<4x192xf32>
    %52 = arith.divf %50, %51 : vector<4x192xf32>
    %53 = vector.extract_strided_slice %46 {offsets = [0, 192], sizes = [4, 64], strides = [1, 1]} : vector<4x256xf32> to vector<4x64xf32>
    %54 = math.tanh %53 : vector<4x64xf32>
    %55 = vector.extract_strided_slice %52 {offsets = [0, 0], sizes = [4, 64], strides = [1, 1]} : vector<4x192xf32> to vector<4x64xf32>
    %56 = vector.extract_strided_slice %52 {offsets = [0, 64], sizes = [4, 64], strides = [1, 1]} : vector<4x192xf32> to vector<4x64xf32>
    %57 = vector.extract_strided_slice %52 {offsets = [0, 128], sizes = [4, 64], strides = [1, 1]} : vector<4x192xf32> to vector<4x64xf32>
    %58 = arith.mulf %56, %37 : vector<4x64xf32>
    %59 = arith.mulf %55, %54 : vector<4x64xf32>
    %60 = arith.addf %58, %59 : vector<4x64xf32>
    %61 = math.tanh %60 : vector<4x64xf32>
    %62 = arith.mulf %57, %61 : vector<4x64xf32>
    %63 = vector.extract_strided_slice %62 {offsets = [0, 0], sizes = [4, 32], strides = [1, 1]} : vector<4x64xf32> to vector<4x32xf32>
    %c4 = arith.constant 4 : index
    %c0_17 = arith.constant 0 : index
    %64 = vector.load %arg12[%c4, %c0_17] : memref<32x64xf32, #tpu.memory_space<vmem>>, vector<4x32xf32>
    tpu.vector_store %arg12[%c4, %c0_17], %63 {strides = array<i32>} : memref<32x64xf32, #tpu.memory_space<vmem>>, vector<4x32xf32>,
    %65 = vector.extract_strided_slice %62 {offsets = [0, 32], sizes = [4, 32], strides = [1, 1]} : vector<4x64xf32> to vector<4x32xf32>
    %c24 = arith.constant 24 : index
    %c32_18 = arith.constant 32 : index
    %66 = vector.load %arg12[%c24, %c32_18] : memref<32x64xf32, #tpu.memory_space<vmem>>, vector<4x32xf32>
    tpu.vector_store %arg12[%c24, %c32_18], %65 {strides = array<i32>} : memref<32x64xf32, #tpu.memory_space<vmem>>, vector<4x32xf32>,
    %67 = vector.extract_strided_slice %17 {offsets = [8, 0], sizes = [4, 256], strides = [1, 1]} : vector<32x256xf32> to vector<4x256xf32>
    %cst_19 = arith.constant dense<0.000000e+00> : vector<4x256xf32>
    %68 = tpu.matmul %62, %18, %cst_19 {dimension_numbers = #tpu.dot_dimension_numbers<[1], [0], [0], [1], [0, 0, 1, 1], [], []>} : vector<4x64xf32>, vector<64x256xf32>, vector<4x256xf32> -> vector<4x256xf32>
    %69 = arith.addf %67, %68 : vector<4x256xf32>
    %70 = vector.extract_strided_slice %69 {offsets = [0, 0], sizes = [4, 192], strides = [1, 1]} : vector<4x256xf32> to vector<4x192xf32>
    %71 = arith.negf %70 : vector<4x192xf32>
    %72 = math.exp %71 : vector<4x192xf32>
    %cst_20 = arith.constant 1.000000e+00 : f32
    %73 = vector.broadcast %cst_20 : f32 to vector<4x192xf32>
    %74 = arith.addf %73, %72 : vector<4x192xf32>
    %75 = arith.divf %73, %74 : vector<4x192xf32>
    %76 = vector.extract_strided_slice %69 {offsets = [0, 192], sizes = [4, 64], strides = [1, 1]} : vector<4x256xf32> to vector<4x64xf32>
    %77 = math.tanh %76 : vector<4x64xf32>
    %78 = vector.extract_strided_slice %75 {offsets = [0, 0], sizes = [4, 64], strides = [1, 1]} : vector<4x192xf32> to vector<4x64xf32>
    %79 = vector.extract_strided_slice %75 {offsets = [0, 64], sizes = [4, 64], strides = [1, 1]} : vector<4x192xf32> to vector<4x64xf32>
    %80 = vector.extract_strided_slice %75 {offsets = [0, 128], sizes = [4, 64], strides = [1, 1]} : vector<4x192xf32> to vector<4x64xf32>
    %81 = arith.mulf %79, %60 : vector<4x64xf32>
    %82 = arith.mulf %78, %77 : vector<4x64xf32>
    %83 = arith.addf %81, %82 : vector<4x64xf32>
    %84 = math.tanh %83 : vector<4x64xf32>
    %85 = arith.mulf %80, %84 : vector<4x64xf32>
    %86 = vector.extract_strided_slice %85 {offsets = [0, 0], sizes = [4, 32], strides = [1, 1]} : vector<4x64xf32> to vector<4x32xf32>
    %c8 = arith.constant 8 : index
    %c0_21 = arith.constant 0 : index
    %87 = vector.load %arg12[%c8, %c0_21] : memref<32x64xf32, #tpu.memory_space<vmem>>, vector<4x32xf32>
    tpu.vector_store %arg12[%c8, %c0_21], %86 {strides = array<i32>} : memref<32x64xf32, #tpu.memory_space<vmem>>, vector<4x32xf32>,
    %88 = vector.extract_strided_slice %85 {offsets = [0, 32], sizes = [4, 32], strides = [1, 1]} : vector<4x64xf32> to vector<4x32xf32>
    %c20 = arith.constant 20 : index
    %c32_22 = arith.constant 32 : index
    %89 = vector.load %arg12[%c20, %c32_22] : memref<32x64xf32, #tpu.memory_space<vmem>>, vector<4x32xf32>
    tpu.vector_store %arg12[%c20, %c32_22], %88 {strides = array<i32>} : memref<32x64xf32, #tpu.memory_space<vmem>>, vector<4x32xf32>,
    %90 = vector.extract_strided_slice %17 {offsets = [12, 0], sizes = [4, 256], strides = [1, 1]} : vector<32x256xf32> to vector<4x256xf32>
    %cst_23 = arith.constant dense<0.000000e+00> : vector<4x256xf32>
    %91 = tpu.matmul %85, %18, %cst_23 {dimension_numbers = #tpu.dot_dimension_numbers<[1], [0], [0], [1], [0, 0, 1, 1], [], []>} : vector<4x64xf32>, vector<64x256xf32>, vector<4x256xf32> -> vector<4x256xf32>
    %92 = arith.addf %90, %91 : vector<4x256xf32>
    %93 = vector.extract_strided_slice %92 {offsets = [0, 0], sizes = [4, 192], strides = [1, 1]} : vector<4x256xf32> to vector<4x192xf32>
    %94 = arith.negf %93 : vector<4x192xf32>
    %95 = math.exp %94 : vector<4x192xf32>
    %cst_24 = arith.constant 1.000000e+00 : f32
    %96 = vector.broadcast %cst_24 : f32 to vector<4x192xf32>
    %97 = arith.addf %96, %95 : vector<4x192xf32>
    %98 = arith.divf %96, %97 : vector<4x192xf32>
    %99 = vector.extract_strided_slice %92 {offsets = [0, 192], sizes = [4, 64], strides = [1, 1]} : vector<4x256xf32> to vector<4x64xf32>
    %100 = math.tanh %99 : vector<4x64xf32>
    %101 = vector.extract_strided_slice %98 {offsets = [0, 0], sizes = [4, 64], strides = [1, 1]} : vector<4x192xf32> to vector<4x64xf32>
    %102 = vector.extract_strided_slice %98 {offsets = [0, 64], sizes = [4, 64], strides = [1, 1]} : vector<4x192xf32> to vector<4x64xf32>
    %103 = vector.extract_strided_slice %98 {offsets = [0, 128], sizes = [4, 64], strides = [1, 1]} : vector<4x192xf32> to vector<4x64xf32>
    %104 = arith.mulf %102, %83 : vector<4x64xf32>
    %105 = arith.mulf %101, %100 : vector<4x64xf32>
    %106 = arith.addf %104, %105 : vector<4x64xf32>
    %107 = math.tanh %106 : vector<4x64xf32>
    %108 = arith.mulf %103, %107 : vector<4x64xf32>
    %109 = vector.extract_strided_slice %108 {offsets = [0, 0], sizes = [4, 32], strides = [1, 1]} : vector<4x64xf32> to vector<4x32xf32>
    %c12 = arith.constant 12 : index
    %c0_25 = arith.constant 0 : index
    %110 = vector.load %arg12[%c12, %c0_25] : memref<32x64xf32, #tpu.memory_space<vmem>>, vector<4x32xf32>
    tpu.vector_store %arg12[%c12, %c0_25], %109 {strides = array<i32>} : memref<32x64xf32, #tpu.memory_space<vmem>>, vector<4x32xf32>,
    %111 = vector.extract_strided_slice %108 {offsets = [0, 32], sizes = [4, 32], strides = [1, 1]} : vector<4x64xf32> to vector<4x32xf32>
    %c16 = arith.constant 16 : index
    %c32_26 = arith.constant 32 : index
    %112 = vector.load %arg12[%c16, %c32_26] : memref<32x64xf32, #tpu.memory_space<vmem>>, vector<4x32xf32>
    tpu.vector_store %arg12[%c16, %c32_26], %111 {strides = array<i32>} : memref<32x64xf32, #tpu.memory_space<vmem>>, vector<4x32xf32>,
    %113 = vector.extract_strided_slice %17 {offsets = [16, 0], sizes = [4, 256], strides = [1, 1]} : vector<32x256xf32> to vector<4x256xf32>
    %cst_27 = arith.constant dense<0.000000e+00> : vector<4x256xf32>
    %114 = tpu.matmul %108, %18, %cst_27 {dimension_numbers = #tpu.dot_dimension_numbers<[1], [0], [0], [1], [0, 0, 1, 1], [], []>} : vector<4x64xf32>, vector<64x256xf32>, vector<4x256xf32> -> vector<4x256xf32>
    %115 = arith.addf %113, %114 : vector<4x256xf32>
    %116 = vector.extract_strided_slice %115 {offsets = [0, 0], sizes = [4, 192], strides = [1, 1]} : vector<4x256xf32> to vector<4x192xf32>
    %117 = arith.negf %116 : vector<4x192xf32>
    %118 = math.exp %117 : vector<4x192xf32>
    %cst_28 = arith.constant 1.000000e+00 : f32
    %119 = vector.broadcast %cst_28 : f32 to vector<4x192xf32>
    %120 = arith.addf %119, %118 : vector<4x192xf32>
    %121 = arith.divf %119, %120 : vector<4x192xf32>
    %122 = vector.extract_strided_slice %115 {offsets = [0, 192], sizes = [4, 64], strides = [1, 1]} : vector<4x256xf32> to vector<4x64xf32>
    %123 = math.tanh %122 : vector<4x64xf32>
    %124 = vector.extract_strided_slice %121 {offsets = [0, 0], sizes = [4, 64], strides = [1, 1]} : vector<4x192xf32> to vector<4x64xf32>
    %125 = vector.extract_strided_slice %121 {offsets = [0, 64], sizes = [4, 64], strides = [1, 1]} : vector<4x192xf32> to vector<4x64xf32>
    %126 = vector.extract_strided_slice %121 {offsets = [0, 128], sizes = [4, 64], strides = [1, 1]} : vector<4x192xf32> to vector<4x64xf32>
    %127 = arith.mulf %125, %106 : vector<4x64xf32>
    %128 = arith.mulf %124, %123 : vector<4x64xf32>
    %129 = arith.addf %127, %128 : vector<4x64xf32>
    %130 = math.tanh %129 : vector<4x64xf32>
    %131 = arith.mulf %126, %130 : vector<4x64xf32>
    %132 = vector.extract_strided_slice %131 {offsets = [0, 0], sizes = [4, 32], strides = [1, 1]} : vector<4x64xf32> to vector<4x32xf32>
    %c16_29 = arith.constant 16 : index
    %c0_30 = arith.constant 0 : index
    %133 = vector.load %arg12[%c16_29, %c0_30] : memref<32x64xf32, #tpu.memory_space<vmem>>, vector<4x32xf32>
    tpu.vector_store %arg12[%c16_29, %c0_30], %132 {strides = array<i32>} : memref<32x64xf32, #tpu.memory_space<vmem>>, vector<4x32xf32>,
    %134 = vector.extract_strided_slice %131 {offsets = [0, 32], sizes = [4, 32], strides = [1, 1]} : vector<4x64xf32> to vector<4x32xf32>
    %c12_31 = arith.constant 12 : index
    %c32_32 = arith.constant 32 : index
    %135 = vector.load %arg12[%c12_31, %c32_32] : memref<32x64xf32, #tpu.memory_space<vmem>>, vector<4x32xf32>
    tpu.vector_store %arg12[%c12_31, %c32_32], %134 {strides = array<i32>} : memref<32x64xf32, #tpu.memory_space<vmem>>, vector<4x32xf32>,
    %136 = vector.extract_strided_slice %17 {offsets = [20, 0], sizes = [4, 256], strides = [1, 1]} : vector<32x256xf32> to vector<4x256xf32>
    %cst_33 = arith.constant dense<0.000000e+00> : vector<4x256xf32>
    %137 = tpu.matmul %131, %18, %cst_33 {dimension_numbers = #tpu.dot_dimension_numbers<[1], [0], [0], [1], [0, 0, 1, 1], [], []>} : vector<4x64xf32>, vector<64x256xf32>, vector<4x256xf32> -> vector<4x256xf32>
    %138 = arith.addf %136, %137 : vector<4x256xf32>
    %139 = vector.extract_strided_slice %138 {offsets = [0, 0], sizes = [4, 192], strides = [1, 1]} : vector<4x256xf32> to vector<4x192xf32>
    %140 = arith.negf %139 : vector<4x192xf32>
    %141 = math.exp %140 : vector<4x192xf32>
    %cst_34 = arith.constant 1.000000e+00 : f32
    %142 = vector.broadcast %cst_34 : f32 to vector<4x192xf32>
    %143 = arith.addf %142, %141 : vector<4x192xf32>
    %144 = arith.divf %142, %143 : vector<4x192xf32>
    %145 = vector.extract_strided_slice %138 {offsets = [0, 192], sizes = [4, 64], strides = [1, 1]} : vector<4x256xf32> to vector<4x64xf32>
    %146 = math.tanh %145 : vector<4x64xf32>
    %147 = vector.extract_strided_slice %144 {offsets = [0, 0], sizes = [4, 64], strides = [1, 1]} : vector<4x192xf32> to vector<4x64xf32>
    %148 = vector.extract_strided_slice %144 {offsets = [0, 64], sizes = [4, 64], strides = [1, 1]} : vector<4x192xf32> to vector<4x64xf32>
    %149 = vector.extract_strided_slice %144 {offsets = [0, 128], sizes = [4, 64], strides = [1, 1]} : vector<4x192xf32> to vector<4x64xf32>
    %150 = arith.mulf %148, %129 : vector<4x64xf32>
    %151 = arith.mulf %147, %146 : vector<4x64xf32>
    %152 = arith.addf %150, %151 : vector<4x64xf32>
    %153 = math.tanh %152 : vector<4x64xf32>
    %154 = arith.mulf %149, %153 : vector<4x64xf32>
    %155 = vector.extract_strided_slice %154 {offsets = [0, 0], sizes = [4, 32], strides = [1, 1]} : vector<4x64xf32> to vector<4x32xf32>
    %c20_35 = arith.constant 20 : index
    %c0_36 = arith.constant 0 : index
    %156 = vector.load %arg12[%c20_35, %c0_36] : memref<32x64xf32, #tpu.memory_space<vmem>>, vector<4x32xf32>
    tpu.vector_store %arg12[%c20_35, %c0_36], %155 {strides = array<i32>} : memref<32x64xf32, #tpu.memory_space<vmem>>, vector<4x32xf32>,
    %157 = vector.extract_strided_slice %154 {offsets = [0, 32], sizes = [4, 32], strides = [1, 1]} : vector<4x64xf32> to vector<4x32xf32>
    %c8_37 = arith.constant 8 : index
    %c32_38 = arith.constant 32 : index
    %158 = vector.load %arg12[%c8_37, %c32_38] : memref<32x64xf32, #tpu.memory_space<vmem>>, vector<4x32xf32>
    tpu.vector_store %arg12[%c8_37, %c32_38], %157 {strides = array<i32>} : memref<32x64xf32, #tpu.memory_space<vmem>>, vector<4x32xf32>,
    %159 = vector.extract_strided_slice %17 {offsets = [24, 0], sizes = [4, 256], strides = [1, 1]} : vector<32x256xf32> to vector<4x256xf32>
    %cst_39 = arith.constant dense<0.000000e+00> : vector<4x256xf32>
    %160 = tpu.matmul %154, %18, %cst_39 {dimension_numbers = #tpu.dot_dimension_numbers<[1], [0], [0], [1], [0, 0, 1, 1], [], []>} : vector<4x64xf32>, vector<64x256xf32>, vector<4x256xf32> -> vector<4x256xf32>
    %161 = arith.addf %159, %160 : vector<4x256xf32>
    %162 = vector.extract_strided_slice %161 {offsets = [0, 0], sizes = [4, 192], strides = [1, 1]} : vector<4x256xf32> to vector<4x192xf32>
    %163 = arith.negf %162 : vector<4x192xf32>
    %164 = math.exp %163 : vector<4x192xf32>
    %cst_40 = arith.constant 1.000000e+00 : f32
    %165 = vector.broadcast %cst_40 : f32 to vector<4x192xf32>
    %166 = arith.addf %165, %164 : vector<4x192xf32>
    %167 = arith.divf %165, %166 : vector<4x192xf32>
    %168 = vector.extract_strided_slice %161 {offsets = [0, 192], sizes = [4, 64], strides = [1, 1]} : vector<4x256xf32> to vector<4x64xf32>
    %169 = math.tanh %168 : vector<4x64xf32>
    %170 = vector.extract_strided_slice %167 {offsets = [0, 0], sizes = [4, 64], strides = [1, 1]} : vector<4x192xf32> to vector<4x64xf32>
    %171 = vector.extract_strided_slice %167 {offsets = [0, 64], sizes = [4, 64], strides = [1, 1]} : vector<4x192xf32> to vector<4x64xf32>
    %172 = vector.extract_strided_slice %167 {offsets = [0, 128], sizes = [4, 64], strides = [1, 1]} : vector<4x192xf32> to vector<4x64xf32>
    %173 = arith.mulf %171, %152 : vector<4x64xf32>
    %174 = arith.mulf %170, %169 : vector<4x64xf32>
    %175 = arith.addf %173, %174 : vector<4x64xf32>
    %176 = math.tanh %175 : vector<4x64xf32>
    %177 = arith.mulf %172, %176 : vector<4x64xf32>
    %178 = vector.extract_strided_slice %177 {offsets = [0, 0], sizes = [4, 32], strides = [1, 1]} : vector<4x64xf32> to vector<4x32xf32>
    %c24_41 = arith.constant 24 : index
    %c0_42 = arith.constant 0 : index
    %179 = vector.load %arg12[%c24_41, %c0_42] : memref<32x64xf32, #tpu.memory_space<vmem>>, vector<4x32xf32>
    tpu.vector_store %arg12[%c24_41, %c0_42], %178 {strides = array<i32>} : memref<32x64xf32, #tpu.memory_space<vmem>>, vector<4x32xf32>,
    %180 = vector.extract_strided_slice %177 {offsets = [0, 32], sizes = [4, 32], strides = [1, 1]} : vector<4x64xf32> to vector<4x32xf32>
    %c4_43 = arith.constant 4 : index
    %c32_44 = arith.constant 32 : index
    %181 = vector.load %arg12[%c4_43, %c32_44] : memref<32x64xf32, #tpu.memory_space<vmem>>, vector<4x32xf32>
    tpu.vector_store %arg12[%c4_43, %c32_44], %180 {strides = array<i32>} : memref<32x64xf32, #tpu.memory_space<vmem>>, vector<4x32xf32>,
    %182 = vector.extract_strided_slice %17 {offsets = [28, 0], sizes = [4, 256], strides = [1, 1]} : vector<32x256xf32> to vector<4x256xf32>
    %cst_45 = arith.constant dense<0.000000e+00> : vector<4x256xf32>
    %183 = tpu.matmul %177, %18, %cst_45 {dimension_numbers = #tpu.dot_dimension_numbers<[1], [0], [0], [1], [0, 0, 1, 1], [], []>} : vector<4x64xf32>, vector<64x256xf32>, vector<4x256xf32> -> vector<4x256xf32>
    %184 = arith.addf %182, %183 : vector<4x256xf32>
    %185 = vector.extract_strided_slice %184 {offsets = [0, 0], sizes = [4, 192], strides = [1, 1]} : vector<4x256xf32> to vector<4x192xf32>
    %186 = arith.negf %185 : vector<4x192xf32>
    %187 = math.exp %186 : vector<4x192xf32>
    %cst_46 = arith.constant 1.000000e+00 : f32
    %188 = vector.broadcast %cst_46 : f32 to vector<4x192xf32>
    %189 = arith.addf %188, %187 : vector<4x192xf32>
    %190 = arith.divf %188, %189 : vector<4x192xf32>
    %191 = vector.extract_strided_slice %184 {offsets = [0, 192], sizes = [4, 64], strides = [1, 1]} : vector<4x256xf32> to vector<4x64xf32>
    %192 = math.tanh %191 : vector<4x64xf32>
    %193 = vector.extract_strided_slice %190 {offsets = [0, 0], sizes = [4, 64], strides = [1, 1]} : vector<4x192xf32> to vector<4x64xf32>
    %194 = vector.extract_strided_slice %190 {offsets = [0, 64], sizes = [4, 64], strides = [1, 1]} : vector<4x192xf32> to vector<4x64xf32>
    %195 = vector.extract_strided_slice %190 {offsets = [0, 128], sizes = [4, 64], strides = [1, 1]} : vector<4x192xf32> to vector<4x64xf32>
    %196 = arith.mulf %194, %175 : vector<4x64xf32>
    %197 = arith.mulf %193, %192 : vector<4x64xf32>
    %198 = arith.addf %196, %197 : vector<4x64xf32>
    %199 = math.tanh %198 : vector<4x64xf32>
    %200 = arith.mulf %195, %199 : vector<4x64xf32>
    %201 = vector.extract_strided_slice %200 {offsets = [0, 0], sizes = [4, 32], strides = [1, 1]} : vector<4x64xf32> to vector<4x32xf32>
    %c28_47 = arith.constant 28 : index
    %c0_48 = arith.constant 0 : index
    %202 = vector.load %arg12[%c28_47, %c0_48] : memref<32x64xf32, #tpu.memory_space<vmem>>, vector<4x32xf32>
    tpu.vector_store %arg12[%c28_47, %c0_48], %201 {strides = array<i32>} : memref<32x64xf32, #tpu.memory_space<vmem>>, vector<4x32xf32>,
    %203 = vector.extract_strided_slice %200 {offsets = [0, 32], sizes = [4, 32], strides = [1, 1]} : vector<4x64xf32> to vector<4x32xf32>
    %c0_49 = arith.constant 0 : index
    %c32_50 = arith.constant 32 : index
    %204 = vector.load %arg12[%c0_49, %c32_50] : memref<32x64xf32, #tpu.memory_space<vmem>>, vector<4x32xf32>
    tpu.vector_store %arg12[%c0_49, %c32_50], %203 {strides = array<i32>} : memref<32x64xf32, #tpu.memory_space<vmem>>, vector<4x32xf32>,
    %c0_51 = arith.constant 0 : index
    %c0_52 = arith.constant 0 : index
    %205 = vector.load %arg12[%c0_51, %c0_52] : memref<32x64xf32, #tpu.memory_space<vmem>>, vector<32x64xf32>
    %c0_53 = arith.constant 0 : index
    %c0_54 = arith.constant 0 : index
    %206 = vector.load %arg4[%c0_53, %c0_54] : memref<64x128xf32, #tpu.memory_space<vmem>>, vector<64x128xf32>
    %cst_55 = arith.constant dense<0.000000e+00> : vector<32x128xf32>
    %207 = tpu.matmul %205, %206, %cst_55 {dimension_numbers = #tpu.dot_dimension_numbers<[1], [0], [0], [1], [0, 0, 1, 1], [], []>} : vector<32x64xf32>, vector<64x128xf32>, vector<32x128xf32> -> vector<32x128xf32>
    %c0_56 = arith.constant 0 : index
    %c0_57 = arith.constant 0 : index
    %208 = vector.load %arg5[%c0_56, %c0_57] : memref<1x128xf32, #tpu.memory_space<vmem>>, vector<1x128xf32>
    %209 = vector.broadcast %208 : vector<1x128xf32> to vector<32x128xf32>
    %210 = arith.addf %207, %209 : vector<32x128xf32>
    %211 = math.tanh %210 : vector<32x128xf32>
    %c0_58 = arith.constant 0 : index
    %c0_59 = arith.constant 0 : index
    %212 = vector.load %arg6[%c0_58, %c0_59] : memref<128x4xf32, #tpu.memory_space<vmem>>, vector<128x4xf32>
    %cst_60 = arith.constant dense<0.000000e+00> : vector<32x4xf32>
    %213 = tpu.matmul %211, %212, %cst_60 {dimension_numbers = #tpu.dot_dimension_numbers<[1], [0], [0], [1], [0, 0, 1, 1], [], []>} : vector<32x128xf32>, vector<128x4xf32>, vector<32x4xf32> -> vector<32x4xf32>
    %214 = vector.shape_cast %213 : vector<32x4xf32> to vector<1x32x4xf32>
    %cst_61 = arith.constant dense<0xFF800000> : vector<1xf32>
    %215 = vector.multi_reduction <maximumf>, %214, %cst_61 [1, 2] : vector<1x32x4xf32> to vector<1xf32>
    %216 = vector.shape_cast %215 : vector<1xf32> to vector<1x1x1xf32>
    %217 = vector.extract %216[0, 0, 0] : f32 from vector<1x1x1xf32>
    %218 = vector.broadcast %217 : f32 to vector<1x1xf32>
    %219 = vector.broadcast %218 : vector<1x1xf32> to vector<32x4xf32>
    %220 = arith.subf %213, %219 : vector<32x4xf32>
    %221 = math.exp %220 : vector<32x4xf32>
    %c0_62 = arith.constant 0 : index
    %c0_63 = arith.constant 0 : index
    %222 = vector.load %arg7[%c0_62, %c0_63] : memref<4x32xf32, #tpu.memory_space<vmem>>, vector<4x32xf32>
    %c0_64 = arith.constant 0 : index
    %c0_65 = arith.constant 0 : index
    %223 = vector.load %arg8[%c0_64, %c0_65] : memref<32x32xf32, #tpu.memory_space<vmem>>, vector<32x32xf32>
    %cst_66 = arith.constant dense<0.000000e+00> : vector<32x4xf32>
    %224 = tpu.matmul %223, %221, %cst_66 {dimension_numbers = #tpu.dot_dimension_numbers<[1], [0], [0], [1], [0, 0, 1, 1], [], []>} : vector<32x32xf32>, vector<32x4xf32>, vector<32x4xf32> -> vector<32x4xf32>
    %cst_67 = arith.constant dense<0.000000e+00> : vector<4x4xf32>
    %225 = tpu.matmul %222, %221, %cst_67 {dimension_numbers = #tpu.dot_dimension_numbers<[1], [0], [0], [1], [0, 0, 1, 1], [], []>} : vector<4x32xf32>, vector<32x4xf32>, vector<4x4xf32> -> vector<4x4xf32>
    %cst_68 = arith.constant dense<0.000000e+00> : vector<4x4xf32>
    %226 = tpu.matmul %222, %224, %cst_68 {dimension_numbers = #tpu.dot_dimension_numbers<[1], [0], [0], [1], [0, 0, 1, 1], [], []>} : vector<4x32xf32>, vector<32x4xf32>, vector<4x4xf32> -> vector<4x4xf32>
    %227 = tpu.reciprocal %225 {approx = true} : vector<4x4xf32> -> vector<4x4xf32>
    %228 = tpu.reciprocal %226 {approx = true} : vector<4x4xf32> -> vector<4x4xf32>
    %229 = tpu.iota {dimensions = array<i32: 0>} : vector<32x1xi32>
    %c3_i32 = arith.constant 3 : i32
    %230 = vector.broadcast %c3_i32 : i32 to vector<32x1xi32>
    %231 = arith.andi %229, %230 : vector<32x1xi32>
    %c2_i32 = arith.constant 2 : i32
    %232 = vector.broadcast %c2_i32 : i32 to vector<32x1xi32>
    %233 = arith.cmpi slt, %231, %232 : vector<32x1xi32>
    %234 = tpu.iota {dimensions = array<i32: 0>} : vector<4x1xi32>
    %c2_i32_69 = arith.constant 2 : i32
    %235 = vector.broadcast %c2_i32_69 : i32 to vector<4x1xi32>
    %236 = arith.cmpi slt, %234, %235 : vector<4x1xi32>
    %237 = vector.extract_strided_slice %221 {offsets = [0, 0], sizes = [32, 1], strides = [1, 1]} : vector<32x4xf32> to vector<32x1xf32>
    %238 = vector.extract_strided_slice %221 {offsets = [0, 2], sizes = [32, 1], strides = [1, 1]} : vector<32x4xf32> to vector<32x1xf32>
    %239 = arith.select %233, %237, %238 : vector<32x1xi1>, vector<32x1xf32>
    %240 = vector.extract_strided_slice %224 {offsets = [0, 3], sizes = [32, 1], strides = [1, 1]} : vector<32x4xf32> to vector<32x1xf32>
    %241 = vector.extract_strided_slice %224 {offsets = [0, 1], sizes = [32, 1], strides = [1, 1]} : vector<32x4xf32> to vector<32x1xf32>
    %242 = arith.select %233, %240, %241 : vector<32x1xi1>, vector<32x1xf32>
    %243 = vector.extract_strided_slice %227 {offsets = [0, 0], sizes = [4, 1], strides = [1, 1]} : vector<4x4xf32> to vector<4x1xf32>
    %244 = vector.extract_strided_slice %227 {offsets = [0, 2], sizes = [4, 1], strides = [1, 1]} : vector<4x4xf32> to vector<4x1xf32>
    %245 = arith.select %236, %243, %244 : vector<4x1xi1>, vector<4x1xf32>
    %246 = vector.extract_strided_slice %228 {offsets = [0, 3], sizes = [4, 1], strides = [1, 1]} : vector<4x4xf32> to vector<4x1xf32>
    %247 = vector.extract_strided_slice %228 {offsets = [0, 1], sizes = [4, 1], strides = [1, 1]} : vector<4x4xf32> to vector<4x1xf32>
    %248 = arith.select %236, %246, %247 : vector<4x1xi1>, vector<4x1xf32>
    %249 = vector.broadcast %239 : vector<32x1xf32> to vector<32x64xf32>
    %250 = arith.mulf %249, %205 : vector<32x64xf32>
    %cst_70 = arith.constant dense<0.000000e+00> : vector<4x64xf32>
    %251 = tpu.matmul %222, %250, %cst_70 {dimension_numbers = #tpu.dot_dimension_numbers<[1], [0], [0], [1], [0, 0, 1, 1], [], []>} : vector<4x32xf32>, vector<32x64xf32>, vector<4x64xf32> -> vector<4x64xf32>
    %252 = vector.broadcast %245 : vector<4x1xf32> to vector<4x64xf32>
    %253 = arith.mulf %252, %251 : vector<4x64xf32>
    %254 = vector.broadcast %242 : vector<32x1xf32> to vector<32x64xf32>
    %255 = arith.mulf %254, %205 : vector<32x64xf32>
    %cst_71 = arith.constant dense<0.000000e+00> : vector<4x64xf32>
    %256 = tpu.matmul %222, %255, %cst_71 {dimension_numbers = #tpu.dot_dimension_numbers<[1], [0], [0], [1], [0, 0, 1, 1], [], []>} : vector<4x32xf32>, vector<32x64xf32>, vector<4x64xf32> -> vector<4x64xf32>
    %257 = vector.broadcast %248 : vector<4x1xf32> to vector<4x64xf32>
    %258 = arith.mulf %257, %256 : vector<4x64xf32>
    %259 = arith.addf %253, %258 : vector<4x64xf32>
    %260 = tpu.concatenate %253, %258, %259 in 1 : vector<4x64xf32>, vector<4x64xf32>, vector<4x64xf32> -> vector<4x192xf32>
    %c0_72 = arith.constant 0 : index
    %c0_73 = arith.constant 0 : index
    %261 = vector.load %arg11[%c0_72, %c0_73] : memref<4x192xf32, #tpu.memory_space<vmem>>, vector<4x192xf32>
    tpu.vector_store %arg11[%c0_72, %c0_73], %260 {strides = array<i32>} : memref<4x192xf32, #tpu.memory_space<vmem>>, vector<4x192xf32>,
    return
  }
}

</mosaic_0001>

<bundles_post_ra>
// kernel: attention_model_forward.1
= control target key start
LH: loop header
LB: loop body
LE: loop exit
PB: predicated region body
PF: predicated region fallthrough
CT: control target
= control target key end

     0   :  { %16 = vsyncpa [#allocation4], 0  ;;  %s2421_s0 = inlined_call_operand.vmem [shape: s32[32,2], index: 0, kind: input, shape index: {}]   ;;  %s2422_s1 = inlined_call_operand.hbm [shape: f32[128,256], index: 1, kind: input, shape index: {}]   ;;  %s2423_s2 = inlined_call_operand.vmem [shape: f32[64,256], index: 2, kind: input, shape index: {}]   ;;  %s2424_s3 = inlined_call_operand.vmem [shape: f32[1,256], index: 3, kind: input, shape index: {}]   ;;  %s2425_s4 = inlined_call_operand.hbm [shape: f32[64,128], index: 4, kind: input, shape index: {}]   ;;  %s2426_s5 = inlined_call_operand.vmem [shape: f32[1,128], index: 5, kind: input, shape index: {}]   ;;  %s2427_s6 = inlined_call_operand.vmem [shape: f32[128,4], index: 6, kind: input, shape index: {}]   ;;  %s2428_s7 = inlined_call_operand.vmem [shape: f32[4,32], index: 7, kind: input, shape index: {}]   ;;  %s2429_s8 = inlined_call_operand.vmem [shape: f32[32,32], index: 8, kind: input, shape index: {}]   ;;  %s2430_s9 = inlined_call_operand.vmem [shape: f32[4,64], index: 9, kind: input, shape index: {}]   ;;  %s2431_s10 = inlined_call_operand.vmem [shape: f32[4,64], index: 10, kind: input, shape index: {}]   ;;  %s2432_s11 = inlined_call_operand.vmem [shape: f32[4,192], index: 11, kind: output, shape index: {}]  }
   0x1   :  { %s24_s19 = sshll.u32 %s2422_s1, 4  ;;  %s25_s19 = int_to_ptr.hbm [resolvable:$true] %s24_s19 }
   0x2   :  { %17 = vsyncpa [#allocation6], 0  ;;  %s1798_s20 = smov [#allocation3]   ;;  %s41_s24 = sshll.u32 %s2425_s4, 4  ;;  %s42_s24 = int_to_ptr.hbm [resolvable:$true] %s41_s24 }
   0x3   :  { %s26_s21 = sshll.u32 %s1798_s20, 4  ;;  %s1799_s25 = smov 256   ;;  %s27_s21 = int_to_ptr.vmem [resolvable:$true] %s26_s21 }
   0x4   :  { %s1800_s26 = smov 16   ;;  %s1801_s27 = smov [#allocation5]  }
   0x5   :  { %32 = dma.hbm_to_vmem [thread:$0]  %s25_s19, 4096, %s27_s21, [#allocation4], %s1799_s25, %s1799_s25, %s1800_s26  }
   0x6   :  { %s43_s28 = sshll.u32 %s1801_s27, 4  ;;  %s1802_s29 = smov 128   ;;  %s44_s28 = int_to_ptr.vmem [resolvable:$true] %s43_s28 }
   0x7   :  { %s1803_s30 = smov 8  }
   0x8   :  { %49 = dma.hbm_to_vmem [thread:$0]  %s42_s24, 1024, %s44_s28, [#allocation6], %s1802_s29, %s1802_s29, %s1803_s30  }
   0x9   :  { %1794 = dma.done.wait [#allocation4], 4096  }
   0xa   :  { %1795 = vsyncadd [#allocation4], 4294963200 }
   0xb   :  { %1796 = dma.done.wait [#allocation6], 1024  }
   0xc   :  { %1797 = vsyncadd [#allocation6], 4294966272  ;;  %v1804_v0 = vmov 0   ;;  %v1805_v1 = vmov 1   ;;  %v70_v2 = vld [vmem:[%s2421_s0] sm:$0xff]  ;;  %v154_v3 = vld [vmem:[#allocation3 + $0xf0] sm:$0xff]  ;;  %v74_v54 = vlaneseq }
   0xd   :  { %1619 = vset.pattern.permute.xlu0 %v1804_v0  ;;  %1621 = vset.pattern.permute.xlu1 %v1804_v0  ;;  %v155_v4 = vld [vmem:[#allocation3 + $0xf8] sm:$0xff]  ;;  %v152_v5 = vld [vmem:[#allocation3 + $0xe0] sm:$0xff]  ;;  %v153_v6 = vld [vmem:[#allocation3 + $0xe8] sm:$0xff]  ;;  %v92_v13 = vadd.s32 64, %v70_v2  ;;  %vm238_vm0 = vcmask 523264   ;;  %v1806_v57 = vmov 1.0  }
   0xe   :  { %1622 = vset.pattern.permute.xlu2 %v1805_v1  ;;  %77 = vperm.xlu0 %1619, %v70_v2   ;;  %v150_v7 = vld [vmem:[#allocation3 + $0xd0] sm:$0xff]  ;;  %v151_v8 = vld [vmem:[#allocation3 + $0xd8] sm:$0xff]  ;;  %v148_v9 = vld [vmem:[#allocation3 + $0xc0] sm:$0xff]  ;;  %v2030_v55 = vand.u32 127, %v74_v54  ;;  %s1807_s25 = smov 64   ;;  %vm344_vm12 = vcmask 257024  }
   0xf   :  { %162 = vmatpush.msra.mxu0 %v154_v3  ;;  %191 = vmatpush.msra.mxu1 %v155_v4  ;;  %v149_v10 = vld [vmem:[#allocation3 + $0xc8] sm:$0xff]  ;;  %v1886_v11 = vld [vmem:[%s2423_s2 + $0x70] sm:$0xff]  ;;  %v1891_v12 = vld [vmem:[%s2423_s2 + $0x78] sm:$0xff]  ;;  %vm346_vm13 = vcmask 519424  }
  0x10   :  { %v146_v14 = vld [vmem:[#allocation3 + $0xb0] sm:$0xff]  ;;  %250 = vmatpush.msra.mxu2 %v1886_v11  ;;  %v1897_v15 = vld [vmem:[%s2423_s2 + $0x60] sm:$0xff]  ;;  %v147_v16 = vld [vmem:[#allocation3 + $0xb8] sm:$0xff]  ;;  %270 = vmatpush.msra.mxu3 %v1891_v12 }
  0x11   :  { %163 = vmatpush.msra.mxu0 %v152_v5  ;;  %192 = vmatpush.msra.mxu1 %v153_v6  ;;  %v144_v17 = vld [vmem:[#allocation3 + $0xa0] sm:$0xff]  ;;  %v1904_v18 = vld [vmem:[%s2423_s2 + $0x68] sm:$0xff]  ;;  %v1910_v20 = vld [vmem:[%s2423_s2 + $0x50] sm:$0xff] }
  0x12   :  { %251 = vmatpush.msra.mxu2 %v1897_v15  ;;  %v145_v19 = vld [vmem:[#allocation3 + $0xa8] sm:$0xff]  ;;  %v142_v21 = vld [vmem:[#allocation3 + $0x90] sm:$0xff]  ;;  %v1915_v22 = vld [vmem:[%s2423_s2 + $0x58] sm:$0xff]  ;;  %271 = vmatpush.msra.mxu3 %v1904_v18 }
  0x13   :  { %164 = vmatpush.msra.mxu0 %v150_v7  ;;  %193 = vmatpush.msra.mxu1 %v151_v8  ;;  %v143_v23 = vld [vmem:[#allocation3 + $0x98] sm:$0xff]  ;;  %v1921_v24 = vld [vmem:[%s2423_s2 + $0x40] sm:$0xff]  ;;  %v1927_v26 = vld [vmem:[%s2423_s2 + $0x48] sm:$0xff] }
  0x14   :  { %v140_v25 = vld [vmem:[#allocation3 + $0x80] sm:$0xff]  ;;  %252 = vmatpush.msra.mxu2 %v1910_v20  ;;  %v141_v27 = vld [vmem:[#allocation3 + $0x88] sm:$0xff]  ;;  %272 = vmatpush.msra.mxu3 %v1915_v22  ;;  %v138_v28 = vld [vmem:[#allocation3 + $0x70] sm:$0xff] }
  0x15   :  { %165 = vmatpush.msra.mxu0 %v148_v9  ;;  %194 = vmatpush.msra.mxu1 %v149_v10  ;;  %v139_v29 = vld [vmem:[#allocation3 + $0x78] sm:$0xff]  ;;  %v136_v30 = vld [vmem:[#allocation3 + $0x60] sm:$0xff]  ;;  %v137_v31 = vld [vmem:[#allocation3 + $0x68] sm:$0xff] }
  0x16   :  { %1620 = vset.pattern.permute.xlu0 %v1805_v1  ;;  %253 = vmatpush.msra.mxu2 %v1921_v24  ;;  %v134_v32 = vld [vmem:[#allocation3 + $0x50] sm:$0xff]  ;;  %v135_v33 = vld [vmem:[#allocation3 + $0x58] sm:$0xff]  ;;  %v132_v36 = vld [vmem:[#allocation3 + $0x40] sm:$0xff] }
  0x17   :  { %166 = vmatpush.msra.mxu0 %v146_v14  ;;  %97 = vperm.xlu0 %1620, %v92_v13   ;;  %v1935_v34 = vld [vmem:[%s2423_s2 + $0x30] sm:$0xff]  ;;  %v1940_v35 = vld [vmem:[%s2423_s2 + $0x38] sm:$0xff]  ;;  %v133_v37 = vld [vmem:[#allocation3 + $0x48] sm:$0xff] }
  0x18   :  { %195 = vmatpush.msra.mxu1 %v147_v16  ;;  %273 = vmatpush.msra.mxu3 %v1927_v26  ;;  %v1947_v38 = vld [vmem:[%s2423_s2 + $0x20] sm:$0xff]  ;;  %v1952_v39 = vld [vmem:[%s2423_s2 + $0x28] sm:$0xff]  ;;  %v130_v40 = vld [vmem:[#allocation3 + $0x30] sm:$0xff] }
  0x19   :  { %167 = vmatpush.msra.mxu0 %v144_v17  ;;  %254 = vmatpush.msra.mxu2 %v1935_v34  ;;  %v131_v41 = vld [vmem:[#allocation3 + $0x38] sm:$0xff]  ;;  %v1957_v42 = vld [vmem:[%s2423_s2 + $0x10] sm:$0xff]  ;;  %v128_v44 = vld [vmem:[#allocation3 + $0x20] sm:$0xff] }
  0x1a   :  { %196 = vmatpush.msra.mxu1 %v145_v19  ;;  %274 = vmatpush.msra.mxu3 %v1940_v35  ;;  %v1962_v43 = vld [vmem:[%s2423_s2 + $0x18] sm:$0xff]  ;;  %v129_v45 = vld [vmem:[#allocation3 + $0x28] sm:$0xff]  ;;  %v1969_v46 = vld [vmem:[%s2423_s2] sm:$0xff] }
  0x1b   :  { %168 = vmatpush.msra.mxu0 %v142_v21  ;;  %255 = vmatpush.msra.mxu2 %v1947_v38  ;;  %v1974_v47 = vld [vmem:[%s2423_s2 + $0x8] sm:$0xff]  ;;  %v236_v48 = vld [vmem:[%s2430_s9] sm:$0xf]  ;;  %v126_v49 = vld [vmem:[#allocation3 + $0x10] sm:$0xff] }
  0x1c   :  { %197 = vmatpush.msra.mxu1 %v143_v23  ;;  %275 = vmatpush.msra.mxu3 %v1952_v39  ;;  %v127_v50 = vld [vmem:[#allocation3 + $0x18] sm:$0xff]  ;;  %v124_v51 = vld [vmem:[#allocation3] sm:$0xff]  ;;  %v125_v52 = vld [vmem:[#allocation3 + $0x8] sm:$0xff] }
  0x1d   :  { %169 = vmatpush.msra.mxu0 %v140_v25  ;;  %256 = vmatpush.msra.mxu2 %v1957_v42  ;;  %v156_v58 = vld [vmem:[%s2424_s3] sm:$0x3] }
  0x1e   :  { %198 = vmatpush.msra.mxu1 %v141_v27  ;;  %276 = vmatpush.msra.mxu3 %v1962_v43  ;;  %v2059_v59 = vperm.slane %v156_v58, 1  ;;  %v237_v3 = vld [vmem:[%s2431_s10] sm:$0xf]  ;;  %v2070_v4 = vperm.slane %v156_v58, 0 }
  0x1f   :  { %170 = vmatpush.msra.mxu0 %v138_v28  ;;  %257 = vmatpush.msra.mxu2 %v1969_v46 }
  0x20   :  { %199 = vmatpush.msra.mxu1 %v139_v29  ;;  %277 = vmatpush.msra.mxu3 %v1974_v47 }
  0x21   :  { %171 = vmatpush.msra.mxu0 %v136_v30  ;;  %1544 = vmatmul.msk.f32.vlgmr.msra.gmra.mxu2 %vm238_vm0, %v236_v48 }
  0x22   :  { %200 = vmatpush.msra.mxu1 %v137_v31  ;;  %1545 = vmatmul.msk.f32.vlgmr.msra.gmra.mxu3 %vm238_vm0, %v236_v48 }
  0x23   :  { %172 = vmatpush.msra.mxu0 %v134_v32  ;;  %359 = vmatpush.msrb.mxu2 %v1886_v11 }
  0x24   :  { %201 = vmatpush.msra.mxu1 %v135_v33  ;;  %379 = vmatpush.msrb.mxu3 %v1891_v12 }
  0x25   :  { %173 = vmatpush.msra.mxu0 %v132_v36  ;;  %360 = vmatpush.msrb.mxu2 %v1897_v15 }
  0x26   :  { %202 = vmatpush.msra.mxu1 %v133_v37  ;;  %380 = vmatpush.msrb.mxu3 %v1904_v18 }
  0x27   :  { %174 = vmatpush.msra.mxu0 %v130_v40  ;;  %361 = vmatpush.msrb.mxu2 %v1910_v20 }
  0x28   :  { %203 = vmatpush.msra.mxu1 %v131_v41  ;;  %381 = vmatpush.msrb.mxu3 %v1915_v22 }
  0x29   :  { %175 = vmatpush.msra.mxu0 %v128_v44  ;;  %362 = vmatpush.msrb.mxu2 %v1921_v24 }
  0x2a   :  { %204 = vmatpush.msra.mxu1 %v129_v45  ;;  %382 = vmatpush.msrb.mxu3 %v1927_v26 }
  0x2b   :  { %176 = vmatpush.msra.mxu0 %v126_v49  ;;  %363 = vmatpush.msrb.mxu2 %v1935_v34 }
  0x2c   :  { %205 = vmatpush.msra.mxu1 %v127_v50  ;;  %383 = vmatpush.msrb.mxu3 %v1940_v35 }
  0x2d   :  { %177 = vmatpush.msra.mxu0 %v124_v51  ;;  %364 = vmatpush.msrb.mxu2 %v1947_v38 }
  0x2e   :  { %206 = vmatpush.msra.mxu1 %v125_v52  ;;  %384 = vmatpush.msrb.mxu3 %v1952_v39 }
  0x2f   :  { %580 = vmatpush.msrb.mxu0 %v1886_v11  ;;  %365 = vmatpush.msrb.mxu2 %v1957_v42 }
  0x30   :  { %600 = vmatpush.msrb.mxu1 %v1891_v12  ;;  %385 = vmatpush.msrb.mxu3 %v1962_v43 }
  0x31   :  { %581 = vmatpush.msrb.mxu0 %v1897_v15  ;;  %366 = vmatpush.msrb.mxu2 %v1969_v46 }
  0x32   :  { %601 = vmatpush.msrb.mxu1 %v1904_v18  ;;  %386 = vmatpush.msrb.mxu3 %v1974_v47 }
  0x33   :  { %582 = vmatpush.msrb.mxu0 %v1910_v20  ;;  %474 = vmatpush.msra.mxu2 %v1886_v11 }
  0x34   :  { %602 = vmatpush.msrb.mxu1 %v1915_v22  ;;  %494 = vmatpush.msra.mxu3 %v1891_v12 }
  0x35   :  { %583 = vmatpush.msrb.mxu0 %v1921_v24  ;;  %475 = vmatpush.msra.mxu2 %v1897_v15 }
  0x36   :  { %603 = vmatpush.msrb.mxu1 %v1927_v26  ;;  %495 = vmatpush.msra.mxu3 %v1904_v18 }
  0x37   :  { %584 = vmatpush.msrb.mxu0 %v1935_v34  ;;  %476 = vmatpush.msra.mxu2 %v1910_v20 }
  0x38   :  { %604 = vmatpush.msrb.mxu1 %v1940_v35  ;;  %496 = vmatpush.msra.mxu3 %v1915_v22 }
  0x39   :  { %585 = vmatpush.msrb.mxu0 %v1947_v38  ;;  %477 = vmatpush.msra.mxu2 %v1921_v24 }
  0x3a   :  { %605 = vmatpush.msrb.mxu1 %v1952_v39  ;;  %497 = vmatpush.msra.mxu3 %v1927_v26 }
  0x3b   :  { %586 = vmatpush.msrb.mxu0 %v1957_v42  ;;  %478 = vmatpush.msra.mxu2 %v1935_v34 }
  0x3c   :  { %606 = vmatpush.msrb.mxu1 %v1962_v43  ;;  %498 = vmatpush.msra.mxu3 %v1940_v35 }
  0x3d   :  { %587 = vmatpush.msrb.mxu0 %v1969_v46  ;;  %479 = vmatpush.msra.mxu2 %v1947_v38 }
  0x3e   :  { %607 = vmatpush.msrb.mxu1 %v1974_v47  ;;  %499 = vmatpush.msra.mxu3 %v1952_v39 }
  0x3f   :  { %480 = vmatpush.msra.mxu2 %v1957_v42 }
  0x40   :  { %500 = vmatpush.msra.mxu3 %v1962_v43 }
  0x41   :  { %481 = vmatpush.msra.mxu2 %v1969_v46 }
  0x42   :  { %501 = vmatpush.msra.mxu3 %v1974_v47 }
  0x80   :  { %v78_v53 = vpop.permute.xlu0 %77 }
  0x81   :  { %vm88_vm1 = vcmp.eq.s32.totalorder %v78_v53, %v2030_v55 }
  0x89   :  { %v98_v56 = vpop.permute.xlu0 %97 }
  0x8a   :  { %vm108_vm2 = vcmp.eq.s32.totalorder %v98_v56, %v2030_v55 }
  0x8b   :  { %vm112_vm3 = vmor %vm88_vm1, %vm108_vm2 }
  0x8c   :  { %1536 = vmatmul.msk.f32.vlgmr.msra.gmra.mxu0 %vm112_vm3, %v1806_v57  ;;  %1540 = vmatmul.msk.f32.vlgmr.msra.gmra.mxu1 %vm112_vm3, %v1806_v57 }
  0x8d   :  { %799 = vmatpush.msra.mxu0 %v1886_v11  ;;  %819 = vmatpush.msra.mxu1 %v1891_v12 }
  0x8f   :  { %800 = vmatpush.msra.mxu0 %v1897_v15  ;;  %820 = vmatpush.msra.mxu1 %v1904_v18 }
  0x91   :  { %801 = vmatpush.msra.mxu0 %v1910_v20  ;;  %821 = vmatpush.msra.mxu1 %v1915_v22 }
  0x93   :  { %802 = vmatpush.msra.mxu0 %v1921_v24  ;;  %822 = vmatpush.msra.mxu1 %v1927_v26 }
  0x95   :  { %803 = vmatpush.msra.mxu0 %v1935_v34  ;;  %823 = vmatpush.msra.mxu1 %v1940_v35 }
  0x97   :  { %804 = vmatpush.msra.mxu0 %v1947_v38  ;;  %824 = vmatpush.msra.mxu1 %v1952_v39 }
  0x99   :  { %805 = vmatpush.msra.mxu0 %v1957_v42  ;;  %825 = vmatpush.msra.mxu1 %v1962_v43 }
  0x9b   :  { %806 = vmatpush.msra.mxu0 %v1969_v46  ;;  %826 = vmatpush.msra.mxu1 %v1974_v47 }
  0xa4   :  { %v259_v7 = vpop.f32.mrf.mxu2 }
  0xa5   :  { %v279_v61 = vpop.f32.mrf.mxu3 }
 0x109   :  { %v208_v60 = vpop.f32.mrf.mxu1  ;;  %v179_v5 = vpop.f32.mrf.mxu0 }
 0x10a   :  { %v2062_v62 = vadd.f32 %v208_v60, %v2059_v59  ;;  %v2073_v6 = vadd.f32 %v179_v5, %v2070_v4 }
 0x10c   :  { %v283_v63 = vadd.f32 %v279_v61, %v2062_v62  ;;  %v282_v8 = vadd.f32 %v259_v7, %v2073_v6 }
 0x10e   :  { %1630 = vtanh.f32 %v283_v63  ;;  %v1546_v9 = vmul.f32 -1.442695, %v282_v8  ;;  %v1547_v41 = vmul.f32 -1.442695, %v283_v63 }
 0x110   :  { %1632 = vpow2.f32 %v1546_v9 }
 0x114   :  { %v1631_v2 = vpop.eup %1630 }
 0x115   :  { %329 = vrot.lane.b32.xlu1 %v1631_v2, %s1807_s25 }
 0x116   :  { %v1633_v10 = vpop.eup %1632 }
 0x117   :  { %v290_v13 = vadd.f32 1.0, %v1633_v10 }
 0x119   :  { %1634 = vrcp.f32 %v290_v13  ;;  %v303_v23 = vand.u32 2147483648, %v290_v13  ;;  %vm297_vm5 = vweird.f32 %v290_v13  ;;  %v301_v25 = vand.u32 2147483647, %v290_v13 }
 0x11b   :  { %v304_v28 = vor.u32 1.1754944e-38, %v303_v23  ;;  %vm302_vm7 = vcmp.eq.f32.partialorder %v301_v25, 8.507059e+37 }
 0x11d   :  { %324 = vrot.lane.b32.xlu1 %v237_v3, %s1807_s25 }
 0x11f   :  { %v1635_v14 = vpop.eup %1634 }
 0x120   :  { %v293_v16 = vmul.f32 %v1635_v14, %v290_v13  ;;  %vm298_vm4 = vweird.f32 %v1635_v14 }
 0x121   :  { %vm299_vm6 = vmor %vm297_vm5, %vm298_vm4 }
 0x122   :  { %v294_v17 = vsub.f32 1.0, %v293_v16 }
 0x124   :  { %v295_v19 = vmul.f32 %v1635_v14, %v294_v17 }
 0x126   :  { %v296_v21 = vadd.f32 %v1635_v14, %v295_v19 }
 0x128   :  { %v300_v27 = vsel %vm299_vm6, %v1635_v14, %v296_v21 }
 0x129   :  { %v305_v30 = vsel %vm302_vm7, %v304_v28, %v300_v27 }
 0x187   :  { %v330_v29 = vpop.permute.xlu1 %329 }
 0x188   :  { %v332_v31 = vmul.f32 %v330_v29, %v305_v30 }
 0x18a   :  { %334 = vrot.lane.b32.xlu2 %v332_v31, %s1807_s25 }
 0x18f   :  { %v325_v32 = vpop.permute.xlu1 %324 }
 0x190   :  { %v327_v33 = vmul.f32 %v325_v32, %v305_v30 }
 0x1e4   :  { %v335_v36 = vpop.permute.xlu2 %334 }
 0x1e5   :  { %v2077_v37 = vadd.f32 %v335_v36, %v327_v33  ;;  %v71_v33 = vld [vmem:[%s2421_s0 + $0x8] sm:$0xff] }
 0x1e6   :  { %v93_v36 = vadd.s32 64, %v71_v33 }
 0x1e7   :  { %1636 = vtanh.f32 %v2077_v37 }
 0x1e8   :  { %1638 = vpow2.f32 %v1547_v41 }
 0x1ed   :  { %v1637_v40 = vpop.eup %1636 }
 0x1ee   :  { %340 = vrot.lane.b32.xlu2 %v1637_v40, %s1807_s25  ;;  %v1639_v44 = vpop.eup %1638  ;;  %v439_v40 = vrot.slane %v2077_v37, 4 }
 0x1ef   :  { %v291_v45 = vadd.f32 1.0, %v1639_v44 }
 0x1f1   :  { %1640 = vrcp.f32 %v291_v45  ;;  %v318_v53 = vand.u32 2147483648, %v291_v45  ;;  %vm312_vm9 = vweird.f32 %v291_v45  ;;  %v316_v56 = vand.u32 2147483647, %v291_v45 }
 0x1f3   :  { %v319_v60 = vor.u32 1.1754944e-38, %v318_v53  ;;  %vm317_vm11 = vcmp.eq.f32.partialorder %v316_v56, 8.507059e+37 }
 0x1f7   :  { %v1641_v48 = vpop.eup %1640 }
 0x1f8   :  { %v308_v49 = vmul.f32 %v1641_v48, %v291_v45  ;;  %vm313_vm8 = vweird.f32 %v1641_v48 }
 0x1f9   :  { %vm314_vm10 = vmor %vm312_vm9, %vm313_vm8 }
 0x1fa   :  { %v309_v50 = vsub.f32 1.0, %v308_v49 }
 0x1fc   :  { %v310_v51 = vmul.f32 %v1641_v48, %v309_v50 }
 0x1fe   :  { %v311_v52 = vadd.f32 %v1641_v48, %v310_v51 }
 0x200   :  { %v315_v58 = vsel %vm314_vm10, %v1641_v48, %v311_v52  ;;  %vm458_vm10 = vcmask 261124  }
 0x201   :  { %v320_v61 = vsel %vm317_vm11, %v319_v60, %v315_v58  ;;  %vm460_vm11 = vcmask 523524  }
 0x248   :  { %v341_v63 = vpop.permute.xlu2 %340 }
 0x249   :  { %v343_v2 = vmul.f32 %v341_v63, %v320_v61 }
 0x24b   :  { %345 = vst.msk [vmem:[#allocation2] sm:$0xf] %vm344_vm12, %v343_v2  ;;  %1548 = vmatmul.msk.f32.vlgmr.msrb.gmra.mxu2 %vm238_vm0, %v343_v2  ;;  %1549 = vmatmul.msk.f32.vlgmr.msrb.gmra.mxu3 %vm238_vm0, %v343_v2 }
 0x24c   :  { %347 = vst.msk [vmem:[#allocation2 + $0x1c] sm:$0xf] %vm346_vm13, %v343_v2  ;;  %693 = vmatpush.msrb.mxu2 %v1886_v11  ;;  %713 = vmatpush.msrb.mxu3 %v1891_v12 }
 0x24e   :  { %694 = vmatpush.msrb.mxu2 %v1897_v15  ;;  %714 = vmatpush.msrb.mxu3 %v1904_v18 }
 0x250   :  { %695 = vmatpush.msrb.mxu2 %v1910_v20  ;;  %715 = vmatpush.msrb.mxu3 %v1915_v22 }
 0x252   :  { %696 = vmatpush.msrb.mxu2 %v1921_v24  ;;  %716 = vmatpush.msrb.mxu3 %v1927_v26 }
 0x254   :  { %697 = vmatpush.msrb.mxu2 %v1935_v34  ;;  %717 = vmatpush.msrb.mxu3 %v1940_v35 }
 0x256   :  { %698 = vmatpush.msrb.mxu2 %v1947_v38  ;;  %718 = vmatpush.msrb.mxu3 %v1952_v39 }
 0x258   :  { %699 = vmatpush.msrb.mxu2 %v1957_v42  ;;  %719 = vmatpush.msrb.mxu3 %v1962_v43 }
 0x25a   :  { %700 = vmatpush.msrb.mxu2 %v1969_v46  ;;  %720 = vmatpush.msrb.mxu3 %v1974_v47 }
 0x2ce   :  { %v388_v3 = vpop.f32.mrf.mxu3  ;;  %v368_v9 = vpop.f32.mrf.mxu2 }
 0x2cf   :  { %v394_v5 = vrot.slane %v388_v3, 4  ;;  %v393_v10 = vrot.slane %v368_v9, 4 }
 0x2d1   :  { %v398_v7 = vadd.f32 %v394_v5, %v2062_v62  ;;  %v397_v13 = vadd.f32 %v393_v10, %v2073_v6 }
 0x2d3   :  { %1642 = vtanh.f32 %v398_v7  ;;  %v1550_v14 = vmul.f32 -1.442695, %v397_v13  ;;  %v1551_v49 = vmul.f32 -1.442695, %v398_v7  ;;  %v72_v13 = vld [vmem:[%s2421_s0 + $0x10] sm:$0xff] }
 0x2d5   :  { %1644 = vpow2.f32 %v1550_v14 }
 0x2d9   :  { %v1643_v8 = vpop.eup %1642 }
 0x2da   :  { %443 = vrot.lane.b32.xlu1 %v1643_v8, %s1807_s25 }
 0x2db   :  { %v1645_v16 = vpop.eup %1644 }
 0x2dc   :  { %v405_v17 = vadd.f32 1.0, %v1645_v16 }
 0x2de   :  { %1646 = vrcp.f32 %v405_v17  ;;  %v418_v62 = vand.u32 2147483648, %v405_v17  ;;  %vm412_vm15 = vweird.f32 %v405_v17  ;;  %v416_v28 = vand.u32 2147483647, %v405_v17 }
 0x2e0   :  { %v419_v30 = vor.u32 1.1754944e-38, %v418_v62  ;;  %vm417_vm2 = vcmp.eq.f32.partialorder %v416_v28, 8.507059e+37 }
 0x2e2   :  { %80 = vperm.xlu1 %1621, %v71_v33  }
 0x2e4   :  { %v1647_v19 = vpop.eup %1646 }
 0x2e5   :  { %v408_v21 = vmul.f32 %v1647_v19, %v405_v17  ;;  %vm413_vm14 = vweird.f32 %v1647_v19 }
 0x2e6   :  { %vm414_vm1 = vmor %vm412_vm15, %vm413_vm14 }
 0x2e7   :  { %v409_v23 = vsub.f32 1.0, %v408_v21 }
 0x2e9   :  { %v410_v25 = vmul.f32 %v1647_v19, %v409_v23  ;;  %v94_v23 = vadd.s32 64, %v72_v13 }
 0x2eb   :  { %v411_v27 = vadd.f32 %v1647_v19, %v410_v25 }
 0x2ed   :  { %v415_v29 = vsel %vm414_vm1, %v1647_v19, %v411_v27 }
 0x2ee   :  { %v420_v6 = vsel %vm417_vm2, %v419_v30, %v415_v29 }
 0x2ef   :  { %v441_v41 = vmul.f32 %v439_v40, %v420_v6 }
 0x34c   :  { %v444_v31 = vpop.permute.xlu1 %443 }
 0x34d   :  { %v446_v32 = vmul.f32 %v444_v31, %v420_v6  ;;  %v73_v6 = vld [vmem:[%s2421_s0 + $0x18] sm:$0xff] }
 0x34f   :  { %448 = vrot.lane.b32.xlu2 %v446_v32, %s1807_s25  ;;  %v95_v32 = vadd.s32 64, %v73_v6 }
 0x354   :  { %v81_v52 = vpop.permute.xlu1 %80 }
 0x355   :  { %vm89_vm3 = vcmp.eq.s32.totalorder %v81_v52, %v2030_v55 }
 0x357   :  { %100 = vperm.xlu2 %1622, %v93_v36  }
 0x35f   :  { %1623 = vset.pattern.permute.xlu2 %v1804_v0 }
 0x360   :  { %83 = vperm.xlu2 %1623, %v72_v13  }
 0x368   :  { %1624 = vset.pattern.permute.xlu2 %v1805_v1 }
 0x369   :  { %106 = vperm.xlu2 %1624, %v95_v32  }
 0x371   :  { %1625 = vset.pattern.permute.xlu2 %v1804_v0 }
 0x3a9   :  { %v449_v44 = vpop.permute.xlu2 %448 }
 0x3aa   :  { %v2110_v45 = vadd.f32 %v449_v44, %v441_v41 }
 0x3ac   :  { %1648 = vtanh.f32 %v2110_v45 }
 0x3ad   :  { %1650 = vpow2.f32 %v1551_v49 }
 0x3b1   :  { %v101_v53 = vpop.permute.xlu2 %100 }
 0x3b2   :  { %v1649_v48 = vpop.eup %1648  ;;  %vm109_vm4 = vcmp.eq.s32.totalorder %v101_v53, %v2030_v55 }
 0x3b3   :  { %454 = vrot.lane.b32.xlu0 %v1649_v48, %s1807_s25  ;;  %v1651_v50 = vpop.eup %1650  ;;  %vm113_vm5 = vmor %vm89_vm3, %vm109_vm4 }
 0x3b4   :  { %v406_v51 = vadd.f32 1.0, %v1651_v50  ;;  %1537 = vmatmul.msk.f32.gmra.mxu0 %vm113_vm5, %v1806_v57  ;;  %1541 = vmatmul.msk.f32.gmra.mxu1 %vm113_vm5, %v1806_v57 }
 0x3b6   :  { %1652 = vrcp.f32 %v406_v51  ;;  %v433_v63 = vand.u32 2147483648, %v406_v51  ;;  %vm427_vm7 = vweird.f32 %v406_v51  ;;  %v431_v2 = vand.u32 2147483647, %v406_v51 }
 0x3b8   :  { %v434_v5 = vor.u32 1.1754944e-38, %v433_v63  ;;  %vm432_vm9 = vcmp.eq.f32.partialorder %v431_v2, 8.507059e+37 }
 0x3bc   :  { %v1653_v37 = vpop.eup %1652 }
 0x3bd   :  { %v423_v56 = vmul.f32 %v1653_v37, %v406_v51  ;;  %vm428_vm6 = vweird.f32 %v1653_v37 }
 0x3be   :  { %vm429_vm8 = vmor %vm427_vm7, %vm428_vm6 }
 0x3bf   :  { %v424_v58 = vsub.f32 1.0, %v423_v56 }
 0x3c1   :  { %v425_v60 = vmul.f32 %v1653_v37, %v424_v58 }
 0x3c3   :  { %v426_v61 = vadd.f32 %v1653_v37, %v425_v60 }
 0x3c5   :  { %v430_v3 = vsel %vm429_vm8, %v1653_v37, %v426_v61  ;;  %v84_v37 = vpop.permute.xlu2 %83 }
 0x3c6   :  { %v435_v7 = vsel %vm432_vm9, %v434_v5, %v430_v3  ;;  %vm90_vm3 = vcmp.eq.s32.totalorder %v84_v37, %v2030_v55 }
 0x3cd   :  { %v107_v63 = vpop.permute.xlu2 %106 }
 0x3ce   :  { %vm111_vm6 = vcmp.eq.s32.totalorder %v107_v63, %v2030_v55 }
 0x425   :  { %v455_v8 = vpop.permute.xlu0 %454 }
 0x426   :  { %v457_v9 = vmul.f32 %v455_v8, %v435_v7 }
 0x428   :  { %459 = vst.msk [vmem:[#allocation2] sm:$0xf0] %vm458_vm10, %v457_v9  ;;  %v463_v10 = vrot.slane %v457_v9, 4 }
 0x429   :  { %461 = vst.msk [vmem:[#allocation2 + $0x14] sm:$0xf0] %vm460_vm11, %v457_v9 }
 0x42a   :  { %1552 = vmatmul.msk.f32.vlgmr.msra.gmra.mxu2 %vm238_vm0, %v463_v10  ;;  %1553 = vmatmul.msk.f32.vlgmr.msra.gmra.mxu3 %vm238_vm0, %v463_v10 }
 0x42b   :  { %912 = vmatpush.msra.mxu2 %v1886_v11  ;;  %932 = vmatpush.msra.mxu3 %v1891_v12 }
 0x42d   :  { %913 = vmatpush.msra.mxu2 %v1897_v15  ;;  %933 = vmatpush.msra.mxu3 %v1904_v18 }
 0x42f   :  { %914 = vmatpush.msra.mxu2 %v1910_v20  ;;  %934 = vmatpush.msra.mxu3 %v1915_v22 }
 0x431   :  { %915 = vmatpush.msra.mxu2 %v1921_v24  ;;  %935 = vmatpush.msra.mxu3 %v1927_v26  ;;  %v211_v14 = vpop.f32.mrf.mxu1  ;;  %v182_v25 = vpop.f32.mrf.mxu0 }
 0x432   :  { %v2143_v16 = vadd.f32 %v211_v14, %v2059_v59  ;;  %v2149_v27 = vadd.f32 %v182_v25, %v2070_v4 }
 0x433   :  { %916 = vmatpush.msra.mxu2 %v1935_v34  ;;  %936 = vmatpush.msra.mxu3 %v1940_v35 }
 0x435   :  { %917 = vmatpush.msra.mxu2 %v1947_v38  ;;  %937 = vmatpush.msra.mxu3 %v1952_v39 }
 0x437   :  { %918 = vmatpush.msra.mxu2 %v1957_v42  ;;  %938 = vmatpush.msra.mxu3 %v1962_v43 }
 0x439   :  { %919 = vmatpush.msra.mxu2 %v1969_v46  ;;  %939 = vmatpush.msra.mxu3 %v1974_v47 }
 0x4ad   :  { %v503_v17 = vpop.f32.mrf.mxu3  ;;  %v483_v1 = vpop.f32.mrf.mxu2 }
 0x4ae   :  { %v507_v19 = vadd.f32 %v503_v17, %v2143_v16  ;;  %v506_v62 = vadd.f32 %v483_v1, %v2149_v27 }
 0x4b0   :  { %1654 = vtanh.f32 %v507_v19  ;;  %v1554_v28 = vmul.f32 -1.442695, %v506_v62 }
 0x4b2   :  { %1656 = vpow2.f32 %v1554_v28 }
 0x4b6   :  { %v1655_v21 = vpop.eup %1654 }
 0x4b7   :  { %552 = vrot.lane.b32.xlu0 %v1655_v21, %s1807_s25 }
 0x4b8   :  { %v1657_v29 = vpop.eup %1656 }
 0x4b9   :  { %v514_v30 = vadd.f32 1.0, %v1657_v29 }
 0x4bb   :  { %1658 = vrcp.f32 %v514_v30  ;;  %v527_v44 = vand.u32 2147483648, %v514_v30  ;;  %vm521_vm15 = vweird.f32 %v514_v30  ;;  %v525_v48 = vand.u32 2147483647, %v514_v30 }
 0x4bd   :  { %v528_v50 = vor.u32 1.1754944e-38, %v527_v44  ;;  %vm526_vm2 = vcmp.eq.f32.partialorder %v525_v48, 8.507059e+37 }
 0x4bf   :  { %103 = vperm.xlu0 %1620, %v94_v23  }
 0x4c1   :  { %v1659_v31 = vpop.eup %1658 }
 0x4c2   :  { %v517_v33 = vmul.f32 %v1659_v31, %v514_v30  ;;  %vm522_vm14 = vweird.f32 %v1659_v31 }
 0x4c3   :  { %vm523_vm1 = vmor %vm521_vm15, %vm522_vm14 }
 0x4c4   :  { %v518_v36 = vsub.f32 1.0, %v517_v33 }
 0x4c6   :  { %v519_v40 = vmul.f32 %v1659_v31, %v518_v36 }
 0x4c7   :  { %1626 = vset.pattern.permute.xlu0 %v1804_v0  ;;  %v548_v0 = vrot.slane %v2110_v45, 4  ;;  %v1555_v45 = vmul.f32 -1.442695, %v507_v19 }
 0x4c8   :  { %v520_v41 = vadd.f32 %v1659_v31, %v519_v40 }
 0x4ca   :  { %v524_v49 = vsel %vm523_vm1, %v1659_v31, %v520_v41 }
 0x4cb   :  { %v529_v52 = vsel %vm526_vm2, %v528_v50, %v524_v49 }
 0x4cc   :  { %v550_v58 = vmul.f32 %v548_v0, %v529_v52 }
 0x529   :  { %v553_v51 = vpop.permute.xlu0 %552 }
 0x52a   :  { %v555_v53 = vmul.f32 %v553_v51, %v529_v52 }
 0x52c   :  { %557 = vrot.lane.b32.xlu1 %v555_v53, %s1807_s25 }
 0x531   :  { %v104_v56 = vpop.permute.xlu0 %103 }
 0x532   :  { %vm110_vm4 = vcmp.eq.s32.totalorder %v104_v56, %v2030_v55 }
 0x533   :  { %vm114_vm5 = vmor %vm90_vm3, %vm110_vm4 }
 0x534   :  { %1538 = vmatmul.msk.f32.gmra.mxu0 %vm114_vm5, %v1806_v57  ;;  %1542 = vmatmul.msk.f32.gmra.mxu1 %vm114_vm5, %v1806_v57 }
 0x535   :  { %86 = vperm.xlu1 %1621, %v73_v6  }
 0x59e   :  { %v558_v60 = vpop.permute.xlu1 %557 }
 0x59f   :  { %v2162_v61 = vadd.f32 %v558_v60, %v550_v58 }
 0x5a1   :  { %1660 = vtanh.f32 %v2162_v61  ;;  %v660_v33 = vrot.slane %v2162_v61, 4 }
 0x5a2   :  { %1662 = vpow2.f32 %v1555_v45 }
 0x5a7   :  { %v1661_v2 = vpop.eup %1660  ;;  %v87_v3 = vpop.permute.xlu1 %86 }
 0x5a8   :  { %vm91_vm7 = vcmp.eq.s32.totalorder %v87_v3, %v2030_v55  ;;  %563 = vrot.lane.b32.xlu0 %v1661_v2, %s1807_s25  ;;  %v1663_v5 = vpop.eup %1662 }
 0x5a9   :  { %vm115_vm8 = vmor %vm91_vm7, %vm111_vm6  ;;  %v515_v7 = vadd.f32 1.0, %v1663_v5 }
 0x5aa   :  { %1539 = vmatmul.msk.f32.gmra.mxu0 %vm115_vm8, %v1806_v57  ;;  %1543 = vmatmul.msk.f32.gmra.mxu1 %vm115_vm8, %v1806_v57 }
 0x5ab   :  { %1664 = vrcp.f32 %v515_v7  ;;  %v542_v17 = vand.u32 2147483648, %v515_v7  ;;  %vm536_vm14 = vweird.f32 %v515_v7  ;;  %v540_v55 = vand.u32 2147483647, %v515_v7 }
 0x5ad   :  { %v543_v23 = vor.u32 1.1754944e-38, %v542_v17  ;;  %vm541_vm1 = vcmp.eq.f32.partialorder %v540_v55, 8.507059e+37 }
 0x5b1   :  { %v1665_v8 = vpop.eup %1664 }
 0x5b2   :  { %v532_v9 = vmul.f32 %v1665_v8, %v515_v7  ;;  %vm537_vm9 = vweird.f32 %v1665_v8 }
 0x5b3   :  { %vm538_vm15 = vmor %vm536_vm14, %vm537_vm9 }
 0x5b4   :  { %v533_v10 = vsub.f32 1.0, %v532_v9 }
 0x5b6   :  { %v534_v13 = vmul.f32 %v1665_v8, %v533_v10 }
 0x5b8   :  { %v535_v14 = vadd.f32 %v1665_v8, %v534_v13 }
 0x5ba   :  { %v539_v21 = vsel %vm538_vm15, %v1665_v8, %v535_v14 }
 0x5bb   :  { %v544_v25 = vsel %vm541_vm1, %v543_v23, %v539_v21 }
 0x61a   :  { %v564_v57 = vpop.permute.xlu0 %563 }
 0x61b   :  { %v566_v19 = vmul.f32 %v564_v57, %v544_v25 }
 0x61d   :  { %567 = vst.msk [vmem:[#allocation2 + $0x8] sm:$0xf] %vm344_vm12, %v566_v19  ;;  %1556 = vmatmul.msk.f32.vlgmr.msrb.gmra.mxu0 %vm238_vm0, %v566_v19  ;;  %1557 = vmatmul.msk.f32.vlgmr.msrb.gmra.mxu1 %vm238_vm0, %v566_v19 }
 0x61e   :  { %568 = vst.msk [vmem:[#allocation2 + $0x14] sm:$0xf] %vm346_vm13, %v566_v19  ;;  %1018 = vmatpush.msrb.mxu0 %v1886_v11  ;;  %1038 = vmatpush.msrb.mxu1 %v1891_v12  ;;  %v2190_v11 = vpop.f32.mrf.mxu1 }
 0x61f   :  { %v2213_v5 = vadd.f32 %v2190_v11, %v2059_v59 }
 0x620   :  { %1019 = vmatpush.msrb.mxu0 %v1897_v15  ;;  %1039 = vmatpush.msrb.mxu1 %v1904_v18 }
 0x622   :  { %1020 = vmatpush.msrb.mxu0 %v1910_v20  ;;  %1040 = vmatpush.msrb.mxu1 %v1915_v22 }
 0x624   :  { %1021 = vmatpush.msrb.mxu0 %v1921_v24  ;;  %1041 = vmatpush.msrb.mxu1 %v1927_v26  ;;  %v2196_v24 = vpop.f32.mrf.mxu0 }
 0x625   :  { %v2219_v13 = vadd.f32 %v2196_v24, %v2070_v4 }
 0x626   :  { %1022 = vmatpush.msrb.mxu0 %v1935_v34  ;;  %1042 = vmatpush.msrb.mxu1 %v1940_v35 }
 0x627   :  { %v2192_v12 = vpop.f32.mrf.mxu1 }
 0x628   :  { %1023 = vmatpush.msrb.mxu0 %v1947_v38  ;;  %1043 = vmatpush.msrb.mxu1 %v1952_v39 }
 0x62a   :  { %1024 = vmatpush.msrb.mxu0 %v1957_v42  ;;  %1044 = vmatpush.msrb.mxu1 %v1962_v43 }
 0x62c   :  { %1025 = vmatpush.msrb.mxu0 %v1969_v46  ;;  %1045 = vmatpush.msrb.mxu1 %v1974_v47  ;;  %v2198_v26 = vpop.f32.mrf.mxu0 }
 0x69a   :  { %v609_v15 = vpop.f32.mrf.mxu1  ;;  %v589_v34 = vpop.f32.mrf.mxu0 }
 0x69b   :  { %v615_v18 = vrot.slane %v609_v15, 4  ;;  %v614_v35 = vrot.slane %v589_v34, 4 }
 0x69d   :  { %v619_v20 = vadd.f32 %v615_v18, %v2143_v16  ;;  %v618_v38 = vadd.f32 %v614_v35, %v2149_v27 }
 0x69f   :  { %1666 = vtanh.f32 %v619_v20  ;;  %v1558_v39 = vmul.f32 -1.442695, %v618_v38  ;;  %v1559_v48 = vmul.f32 -1.442695, %v619_v20 }
 0x6a1   :  { %1668 = vpow2.f32 %v1558_v39 }
 0x6a5   :  { %v1667_v22 = vpop.eup %1666 }
 0x6a6   :  { %664 = vrot.lane.b32.xlu1 %v1667_v22, %s1807_s25 }
 0x6a7   :  { %v1669_v42 = vpop.eup %1668 }
 0x6a8   :  { %v626_v43 = vadd.f32 1.0, %v1669_v42 }
 0x6aa   :  { %1670 = vrcp.f32 %v626_v43  ;;  %v639_v28 = vand.u32 2147483648, %v626_v43  ;;  %vm633_vm3 = vweird.f32 %v626_v43  ;;  %v637_v29 = vand.u32 2147483647, %v626_v43 }
 0x6ac   :  { %v640_v31 = vor.u32 1.1754944e-38, %v639_v28  ;;  %vm638_vm5 = vcmp.eq.f32.partialorder %v637_v29, 8.507059e+37 }
 0x6b0   :  { %v1671_v46 = vpop.eup %1670 }
 0x6b1   :  { %v629_v47 = vmul.f32 %v1671_v46, %v626_v43  ;;  %vm634_vm2 = vweird.f32 %v1671_v46 }
 0x6b2   :  { %vm635_vm4 = vmor %vm633_vm3, %vm634_vm2 }
 0x6b3   :  { %v630_v16 = vsub.f32 1.0, %v629_v47 }
 0x6b5   :  { %v631_v1 = vmul.f32 %v1671_v46, %v630_v16 }
 0x6b7   :  { %v632_v62 = vadd.f32 %v1671_v46, %v631_v1 }
 0x6b9   :  { %v636_v30 = vsel %vm635_vm4, %v1671_v46, %v632_v62 }
 0x6ba   :  { %v641_v27 = vsel %vm638_vm5, %v640_v31, %v636_v30 }
 0x6bb   :  { %v662_v36 = vmul.f32 %v660_v33, %v641_v27 }
 0x718   :  { %v665_v6 = vpop.permute.xlu1 %664 }
 0x719   :  { %v667_v32 = vmul.f32 %v665_v6, %v641_v27 }
 0x71b   :  { %669 = vrot.lane.b32.xlu2 %v667_v32, %s1807_s25 }
 0x775   :  { %v670_v40 = vpop.permute.xlu2 %669 }
 0x776   :  { %v2203_v41 = vadd.f32 %v670_v40, %v662_v36 }
 0x778   :  { %1672 = vtanh.f32 %v2203_v41  ;;  %v767_v38 = vrot.slane %v2203_v41, 4 }
 0x779   :  { %1674 = vpow2.f32 %v1559_v48 }
 0x77e   :  { %v1673_v44 = vpop.eup %1672 }
 0x77f   :  { %675 = vrot.lane.b32.xlu0 %v1673_v44, %s1807_s25  ;;  %v1675_v49 = vpop.eup %1674 }
 0x780   :  { %v627_v50 = vadd.f32 1.0, %v1675_v49 }
 0x782   :  { %1676 = vrcp.f32 %v627_v50  ;;  %v654_v0 = vand.u32 2147483648, %v627_v50  ;;  %vm648_vm7 = vweird.f32 %v627_v50  ;;  %v652_v58 = vand.u32 2147483647, %v627_v50 }
 0x784   :  { %v655_v61 = vor.u32 1.1754944e-38, %v654_v0  ;;  %vm653_vm9 = vcmp.eq.f32.partialorder %v652_v58, 8.507059e+37 }
 0x788   :  { %v1677_v51 = vpop.eup %1676 }
 0x789   :  { %v644_v52 = vmul.f32 %v1677_v51, %v627_v50  ;;  %vm649_vm6 = vweird.f32 %v1677_v51 }
 0x78a   :  { %vm650_vm8 = vmor %vm648_vm7, %vm649_vm6 }
 0x78b   :  { %v645_v53 = vsub.f32 1.0, %v644_v52 }
 0x78d   :  { %v646_v37 = vmul.f32 %v1677_v51, %v645_v53 }
 0x78f   :  { %v647_v56 = vadd.f32 %v1677_v51, %v646_v37 }
 0x791   :  { %v651_v60 = vsel %vm650_vm8, %v1677_v51, %v647_v56 }
 0x792   :  { %v656_v63 = vsel %vm653_vm9, %v655_v61, %v651_v60 }
 0x7f1   :  { %v676_v2 = vpop.permute.xlu0 %675 }
 0x7f2   :  { %v678_v3 = vmul.f32 %v676_v2, %v656_v63 }
 0x7f4   :  { %679 = vst.msk [vmem:[#allocation2 + $0x8] sm:$0xf0] %vm458_vm10, %v678_v3  ;;  %v682_v45 = vrot.slane %v678_v3, 4 }
 0x7f5   :  { %680 = vst.msk [vmem:[#allocation2 + $0xc] sm:$0xf0] %vm460_vm11, %v678_v3 }
 0x7f6   :  { %1560 = vmatmul.msk.f32.vlgmr.msrb.gmra.mxu2 %vm238_vm0, %v682_v45  ;;  %1561 = vmatmul.msk.f32.vlgmr.msrb.gmra.mxu3 %vm238_vm0, %v682_v45 }
 0x879   :  { %v722_v7 = vpop.f32.mrf.mxu3  ;;  %v702_v10 = vpop.f32.mrf.mxu2 }
 0x87a   :  { %v726_v8 = vadd.f32 %v722_v7, %v2213_v5  ;;  %v725_v14 = vadd.f32 %v702_v10, %v2219_v13 }
 0x87c   :  { %1678 = vtanh.f32 %v726_v8  ;;  %v1562_v17 = vmul.f32 -1.442695, %v725_v14  ;;  %v1563_v47 = vmul.f32 -1.442695, %v726_v8 }
 0x87e   :  { %1680 = vpow2.f32 %v1562_v17 }
 0x882   :  { %v1679_v9 = vpop.eup %1678 }
 0x883   :  { %771 = vrot.lane.b32.xlu1 %v1679_v9, %s1807_s25 }
 0x884   :  { %v1681_v55 = vpop.eup %1680 }
 0x885   :  { %v733_v21 = vadd.f32 1.0, %v1681_v55 }
 0x887   :  { %1682 = vrcp.f32 %v733_v21  ;;  %v746_v15 = vand.u32 2147483648, %v733_v21  ;;  %vm740_vm15 = vweird.f32 %v733_v21  ;;  %v744_v18 = vand.u32 2147483647, %v733_v21 }
 0x889   :  { %v747_v22 = vor.u32 1.1754944e-38, %v746_v15  ;;  %vm745_vm2 = vcmp.eq.f32.partialorder %v744_v18, 8.507059e+37 }
 0x88d   :  { %v1683_v23 = vpop.eup %1682 }
 0x88e   :  { %v736_v25 = vmul.f32 %v1683_v23, %v733_v21  ;;  %vm741_vm14 = vweird.f32 %v1683_v23 }
 0x88f   :  { %vm742_vm1 = vmor %vm740_vm15, %vm741_vm14 }
 0x890   :  { %v737_v57 = vsub.f32 1.0, %v736_v25 }
 0x892   :  { %v738_v19 = vmul.f32 %v1683_v23, %v737_v57 }
 0x894   :  { %v739_v11 = vadd.f32 %v1683_v23, %v738_v19 }
 0x896   :  { %v743_v20 = vsel %vm742_vm1, %v1683_v23, %v739_v11 }
 0x897   :  { %v748_v34 = vsel %vm745_vm2, %v747_v22, %v743_v20 }
 0x898   :  { %v769_v39 = vmul.f32 %v767_v38, %v748_v34 }
 0x8f5   :  { %v772_v24 = vpop.permute.xlu1 %771 }
 0x8f6   :  { %v774_v35 = vmul.f32 %v772_v24, %v748_v34 }
 0x8f8   :  { %776 = vrot.lane.b32.xlu2 %v774_v35, %s1807_s25 }
 0x952   :  { %v777_v42 = vpop.permute.xlu2 %776 }
 0x953   :  { %v779_v43 = vadd.f32 %v777_v42, %v769_v39 }
 0x955   :  { %1684 = vtanh.f32 %v779_v43 }
 0x956   :  { %1686 = vpow2.f32 %v1563_v47 }
 0x95b   :  { %v1685_v46 = vpop.eup %1684 }
 0x95c   :  { %782 = vrot.lane.b32.xlu0 %v1685_v46, %s1807_s25  ;;  %v1687_v16 = vpop.eup %1686  ;;  %v2243_v46 = vadd.f32 %v2192_v12, %v2059_v59 }
 0x95d   :  { %v734_v1 = vadd.f32 1.0, %v1687_v16 }
 0x95f   :  { %1688 = vrcp.f32 %v734_v1  ;;  %v761_v6 = vand.u32 2147483648, %v734_v1  ;;  %vm755_vm4 = vweird.f32 %v734_v1  ;;  %v759_v27 = vand.u32 2147483647, %v734_v1 }
 0x961   :  { %v762_v33 = vor.u32 1.1754944e-38, %v761_v6  ;;  %vm760_vm6 = vcmp.eq.f32.partialorder %v759_v27, 8.507059e+37 }
 0x965   :  { %v1689_v62 = vpop.eup %1688 }
 0x966   :  { %v751_v28 = vmul.f32 %v1689_v62, %v734_v1  ;;  %vm756_vm3 = vweird.f32 %v1689_v62 }
 0x967   :  { %vm757_vm5 = vmor %vm755_vm4, %vm756_vm3 }
 0x968   :  { %v752_v29 = vsub.f32 1.0, %v751_v28  ;;  %v2249_v28 = vadd.f32 %v2198_v26, %v2070_v4 }
 0x96a   :  { %v753_v30 = vmul.f32 %v1689_v62, %v752_v29 }
 0x96c   :  { %v754_v31 = vadd.f32 %v1689_v62, %v753_v30 }
 0x96e   :  { %v758_v32 = vsel %vm757_vm5, %v1689_v62, %v754_v31 }
 0x96f   :  { %v763_v36 = vsel %vm760_vm6, %v762_v33, %v758_v32 }
 0x9ce   :  { %v783_v40 = vpop.permute.xlu0 %782 }
 0x9cf   :  { %v785_v41 = vmul.f32 %v783_v40, %v763_v36 }
 0x9d1   :  { %786 = vst.msk [vmem:[#allocation2 + $0x10] sm:$0xf] %vm344_vm12, %v785_v41  ;;  %1564 = vmatmul.msk.f32.vlgmr.msra.gmra.mxu0 %vm238_vm0, %v785_v41  ;;  %1565 = vmatmul.msk.f32.vlgmr.msra.gmra.mxu1 %vm238_vm0, %v785_v41 }
 0x9d2   :  { %787 = vst.msk [vmem:[#allocation2 + $0xc] sm:$0xf] %vm346_vm13, %v785_v41 }
 0xa4e   :  { %v828_v44 = vpop.f32.mrf.mxu1  ;;  %v808_v51 = vpop.f32.mrf.mxu0 }
 0xa4f   :  { %v834_v48 = vrot.slane %v828_v44, 4  ;;  %v833_v52 = vrot.slane %v808_v51, 4 }
 0xa51   :  { %v838_v49 = vadd.f32 %v834_v48, %v2213_v5  ;;  %v837_v53 = vadd.f32 %v833_v52, %v2219_v13  ;;  %v879_v13 = vrot.slane %v779_v43, 4 }
 0xa53   :  { %1690 = vtanh.f32 %v838_v49  ;;  %v1566_v37 = vmul.f32 -1.442695, %v837_v53  ;;  %v1567_v23 = vmul.f32 -1.442695, %v838_v49 }
 0xa55   :  { %1692 = vpow2.f32 %v1566_v37 }
 0xa59   :  { %v1691_v50 = vpop.eup %1690 }
 0xa5a   :  { %883 = vrot.lane.b32.xlu1 %v1691_v50, %s1807_s25 }
 0xa5b   :  { %v1693_v56 = vpop.eup %1692 }
 0xa5c   :  { %v845_v0 = vadd.f32 1.0, %v1693_v56 }
 0xa5e   :  { %1694 = vrcp.f32 %v845_v0  ;;  %v858_v3 = vand.u32 2147483648, %v845_v0  ;;  %vm852_vm8 = vweird.f32 %v845_v0  ;;  %v856_v45 = vand.u32 2147483647, %v845_v0 }
 0xa60   :  { %v859_v7 = vor.u32 1.1754944e-38, %v858_v3  ;;  %vm857_vm14 = vcmp.eq.f32.partialorder %v856_v45, 8.507059e+37 }
 0xa64   :  { %v1695_v58 = vpop.eup %1694 }
 0xa65   :  { %v848_v60 = vmul.f32 %v1695_v58, %v845_v0  ;;  %vm853_vm7 = vweird.f32 %v1695_v58 }
 0xa66   :  { %vm854_vm9 = vmor %vm852_vm8, %vm853_vm7 }
 0xa67   :  { %v849_v61 = vsub.f32 1.0, %v848_v60 }
 0xa69   :  { %v850_v63 = vmul.f32 %v1695_v58, %v849_v61 }
 0xa6b   :  { %v851_v2 = vadd.f32 %v1695_v58, %v850_v63 }
 0xa6d   :  { %v855_v5 = vsel %vm854_vm9, %v1695_v58, %v851_v2 }
 0xa6e   :  { %v860_v9 = vsel %vm857_vm14, %v859_v7, %v855_v5 }
 0xa6f   :  { %v881_v14 = vmul.f32 %v879_v13, %v860_v9 }
 0xacc   :  { %v884_v8 = vpop.permute.xlu1 %883 }
 0xacd   :  { %v886_v10 = vmul.f32 %v884_v8, %v860_v9 }
 0xacf   :  { %888 = vrot.lane.b32.xlu2 %v886_v10, %s1807_s25 }
 0xb29   :  { %v889_v17 = vpop.permute.xlu2 %888 }
 0xb2a   :  { %v2233_v55 = vadd.f32 %v889_v17, %v881_v14 }
 0xb2c   :  { %1696 = vtanh.f32 %v2233_v55  ;;  %v986_v49 = vrot.slane %v2233_v55, 4 }
 0xb2d   :  { %1698 = vpow2.f32 %v1567_v23 }
 0xb32   :  { %v1697_v21 = vpop.eup %1696 }
 0xb33   :  { %894 = vrot.lane.b32.xlu0 %v1697_v21, %s1807_s25  ;;  %v1699_v25 = vpop.eup %1698 }
 0xb34   :  { %v846_v57 = vadd.f32 1.0, %v1699_v25 }
 0xb36   :  { %1700 = vrcp.f32 %v846_v57  ;;  %v873_v22 = vand.u32 2147483648, %v846_v57  ;;  %vm867_vm1 = vweird.f32 %v846_v57  ;;  %v871_v24 = vand.u32 2147483647, %v846_v57 }
 0xb38   :  { %v874_v35 = vor.u32 1.1754944e-38, %v873_v22  ;;  %vm872_vm3 = vcmp.eq.f32.partialorder %v871_v24, 8.507059e+37 }
 0xb3c   :  { %v1701_v19 = vpop.eup %1700 }
 0xb3d   :  { %v863_v11 = vmul.f32 %v1701_v19, %v846_v57  ;;  %vm868_vm15 = vweird.f32 %v1701_v19 }
 0xb3e   :  { %vm869_vm2 = vmor %vm867_vm1, %vm868_vm15 }
 0xb3f   :  { %v864_v15 = vsub.f32 1.0, %v863_v11 }
 0xb41   :  { %v865_v18 = vmul.f32 %v1701_v19, %v864_v15 }
 0xb43   :  { %v866_v20 = vadd.f32 %v1701_v19, %v865_v18 }
 0xb45   :  { %v870_v34 = vsel %vm869_vm2, %v1701_v19, %v866_v20 }
 0xb46   :  { %v875_v38 = vsel %vm872_vm3, %v874_v35, %v870_v34 }
 0xba5   :  { %v895_v39 = vpop.permute.xlu0 %894 }
 0xba6   :  { %v897_v42 = vmul.f32 %v895_v39, %v875_v38 }
 0xba8   :  { %898 = vst.msk [vmem:[#allocation2 + $0x10] sm:$0xf0] %vm458_vm10, %v897_v42  ;;  %v901_v43 = vrot.slane %v897_v42, 4 }
 0xba9   :  { %899 = vst.msk [vmem:[#allocation2 + $0x4] sm:$0xf0] %vm460_vm11, %v897_v42 }
 0xbaa   :  { %1568 = vmatmul.msk.f32.vlgmr.msra.gmra.mxu2 %vm238_vm0, %v901_v43  ;;  %1569 = vmatmul.msk.f32.vlgmr.msra.gmra.mxu3 %vm238_vm0, %v901_v43 }
 0xc2d   :  { %v941_v47 = vpop.f32.mrf.mxu3  ;;  %v921_v62 = vpop.f32.mrf.mxu2 }
 0xc2e   :  { %v945_v16 = vadd.f32 %v941_v47, %v2243_v46  ;;  %v944_v29 = vadd.f32 %v921_v62, %v2249_v28  ;;  %v1130_v47 = vld [vmem:[#allocation5 + $0x38] sm:$0xff] }
 0xc2f   :  { %1155 = vmatpush.msrb.mxu2 %v1130_v47 }
 0xc30   :  { %1702 = vtanh.f32 %v945_v16  ;;  %v1570_v30 = vmul.f32 -1.442695, %v944_v29  ;;  %v1571_v37 = vmul.f32 -1.442695, %v945_v16  ;;  %v1129_v16 = vld [vmem:[#allocation5 + $0x30] sm:$0xff] }
 0xc31   :  { %1156 = vmatpush.msrb.mxu2 %v1129_v16 }
 0xc32   :  { %1704 = vpow2.f32 %v1570_v30 }
 0xc36   :  { %v1703_v1 = vpop.eup %1702 }
 0xc37   :  { %990 = vrot.lane.b32.xlu1 %v1703_v1, %s1807_s25  ;;  %v1128_v1 = vld [vmem:[#allocation5 + $0x28] sm:$0xff] }
 0xc38   :  { %v1705_v31 = vpop.eup %1704  ;;  %1157 = vmatpush.msrb.mxu2 %v1128_v1 }
 0xc39   :  { %v952_v6 = vadd.f32 1.0, %v1705_v31 }
 0xc3b   :  { %1706 = vrcp.f32 %v952_v6  ;;  %v965_v36 = vand.u32 2147483648, %v952_v6  ;;  %vm959_vm5 = vweird.f32 %v952_v6  ;;  %v963_v40 = vand.u32 2147483647, %v952_v6 }
 0xc3d   :  { %v966_v4 = vor.u32 1.1754944e-38, %v965_v36  ;;  %vm964_vm7 = vcmp.eq.f32.partialorder %v963_v40, 8.507059e+37  ;;  %v1124_v36 = vld [vmem:[#allocation5 + $0x8] sm:$0xff]  ;;  %v1123_v40 = vld [vmem:[#allocation5] sm:$0xff] }
 0xc41   :  { %v1707_v59 = vpop.eup %1706 }
 0xc42   :  { %v955_v12 = vmul.f32 %v1707_v59, %v952_v6  ;;  %vm960_vm4 = vweird.f32 %v1707_v59 }
 0xc43   :  { %vm961_vm6 = vmor %vm959_vm5, %vm960_vm4 }
 0xc44   :  { %v956_v27 = vsub.f32 1.0, %v955_v12 }
 0xc46   :  { %v957_v32 = vmul.f32 %v1707_v59, %v956_v27  ;;  %v1127_v27 = vld [vmem:[#allocation5 + $0x20] sm:$0xff] }
 0xc47   :  { %1158 = vmatpush.msrb.mxu2 %v1127_v27 }
 0xc48   :  { %v958_v33 = vadd.f32 %v1707_v59, %v957_v32  ;;  %v1126_v32 = vld [vmem:[#allocation5 + $0x18] sm:$0xff] }
 0xc49   :  { %1159 = vmatpush.msrb.mxu2 %v1126_v32 }
 0xc4a   :  { %v962_v41 = vsel %vm961_vm6, %v1707_v59, %v958_v33  ;;  %v1125_v33 = vld [vmem:[#allocation5 + $0x10] sm:$0xff] }
 0xc4b   :  { %v967_v44 = vsel %vm964_vm7, %v966_v4, %v962_v41  ;;  %1160 = vmatpush.msrb.mxu2 %v1125_v33 }
 0xc4c   :  { %v988_v50 = vmul.f32 %v986_v49, %v967_v44 }
 0xc4d   :  { %1161 = vmatpush.msrb.mxu2 %v1124_v36 }
 0xc4f   :  { %1162 = vmatpush.msrb.mxu2 %v1123_v40 }
 0xca9   :  { %v991_v26 = vpop.permute.xlu1 %990 }
 0xcaa   :  { %v993_v48 = vmul.f32 %v991_v26, %v967_v44 }
 0xcac   :  { %995 = vrot.lane.b32.xlu2 %v993_v48, %s1807_s25 }
 0xd06   :  { %v996_v51 = vpop.permute.xlu2 %995 }
 0xd07   :  { %v2254_v52 = vadd.f32 %v996_v51, %v988_v50 }
 0xd09   :  { %1708 = vtanh.f32 %v2254_v52  ;;  %v1098_v62 = vrot.slane %v2254_v52, 4 }
 0xd0a   :  { %1710 = vpow2.f32 %v1571_v37 }
 0xd0f   :  { %v1709_v53 = vpop.eup %1708 }
 0xd10   :  { %1001 = vrot.lane.b32.xlu0 %v1709_v53, %s1807_s25  ;;  %v1711_v56 = vpop.eup %1710 }
 0xd11   :  { %v953_v0 = vadd.f32 1.0, %v1711_v56 }
 0xd13   :  { %1712 = vrcp.f32 %v953_v0  ;;  %v980_v3 = vand.u32 2147483648, %v953_v0  ;;  %vm974_vm9 = vweird.f32 %v953_v0  ;;  %v978_v45 = vand.u32 2147483647, %v953_v0 }
 0xd15   :  { %v981_v7 = vor.u32 1.1754944e-38, %v980_v3  ;;  %vm979_vm15 = vcmp.eq.f32.partialorder %v978_v45, 8.507059e+37  ;;  %v1190_v3 = vld [vmem:[%s2427_s6 + $0x50] sm:$0xff]  ;;  %v1189_v45 = vld [vmem:[%s2427_s6 + $0x48] sm:$0xff] }
 0xd19   :  { %v1713_v58 = vpop.eup %1712 }
 0xd1a   :  { %v970_v60 = vmul.f32 %v1713_v58, %v953_v0  ;;  %vm975_vm8 = vweird.f32 %v1713_v58  ;;  %v1195_v0 = vld [vmem:[%s2427_s6 + $0x78] sm:$0xff] }
 0xd1b   :  { %vm976_vm14 = vmor %vm974_vm9, %vm975_vm8  ;;  %1196 = vmatpush.msra.mxu2 %v1195_v0  ;;  %1588 = vmatpush.msrb.mxu3 %v1195_v0  ;;  %v1256_v0 = vld [vmem:[%s2429_s8] sm:$0xff] }
 0xd1c   :  { %v971_v61 = vsub.f32 1.0, %v970_v60  ;;  %v1193_v60 = vld [vmem:[%s2427_s6 + $0x68] sm:$0xff] }
 0xd1e   :  { %v972_v63 = vmul.f32 %v1713_v58, %v971_v61  ;;  %v1192_v61 = vld [vmem:[%s2427_s6 + $0x60] sm:$0xff] }
 0xd20   :  { %v973_v2 = vadd.f32 %v1713_v58, %v972_v63  ;;  %v1191_v63 = vld [vmem:[%s2427_s6 + $0x58] sm:$0xff] }
 0xd22   :  { %v977_v5 = vsel %vm976_vm14, %v1713_v58, %v973_v2  ;;  %v1194_v58 = vld [vmem:[%s2427_s6 + $0x70] sm:$0xff] }
 0xd23   :  { %v982_v8 = vsel %vm979_vm15, %v981_v7, %v977_v5  ;;  %1197 = vmatpush.msra.mxu2 %v1194_v58  ;;  %1589 = vmatpush.msrb.mxu3 %v1194_v58  ;;  %v1188_v5 = vld [vmem:[%s2427_s6 + $0x40] sm:$0xff]  ;;  %v1187_v7 = vld [vmem:[%s2427_s6 + $0x38] sm:$0xff] }
 0xd25   :  { %1198 = vmatpush.msra.mxu2 %v1193_v60  ;;  %1590 = vmatpush.msrb.mxu3 %v1193_v60  ;;  %v1257_v60 = vld [vmem:[%s2429_s8 + $0x8] sm:$0xff] }
 0xd27   :  { %1199 = vmatpush.msra.mxu2 %v1192_v61  ;;  %1591 = vmatpush.msrb.mxu3 %v1192_v61  ;;  %v1258_v61 = vld [vmem:[%s2429_s8 + $0x10] sm:$0xff] }
 0xd29   :  { %1200 = vmatpush.msra.mxu2 %v1191_v63  ;;  %1592 = vmatpush.msrb.mxu3 %v1191_v63  ;;  %v1259_v63 = vld [vmem:[%s2429_s8 + $0x18] sm:$0xff] }
 0xd2b   :  { %1201 = vmatpush.msra.mxu2 %v1190_v3  ;;  %1593 = vmatpush.msrb.mxu3 %v1190_v3  ;;  %v2360_v3 = vld [vmem:[%s2428_s7] sm:$0xf]  ;;  %s1809_s7 = smov 2  }
 0xd2d   :  { %1202 = vmatpush.msra.mxu2 %v1189_v45  ;;  %1594 = vmatpush.msrb.mxu3 %v1189_v45 }
 0xd2f   :  { %1203 = vmatpush.msra.mxu2 %v1188_v5  ;;  %1595 = vmatpush.msrb.mxu3 %v1188_v5  ;;  %v2365_v5 = vshrl.u32 %v74_v54, 7 }
 0xd31   :  { %1204 = vmatpush.msra.mxu2 %v1187_v7  ;;  %1596 = vmatpush.msrb.mxu3 %v1187_v7  ;;  %v1352_v7 = vand.u32 3, %v2365_v5  ;;  %v1350_v54 = vadd.s32 16, %v2365_v5  ;;  %vm1360_vm15 = vcmp.lt.s32.totalorder %v2365_v5, 2 }
 0xd33   :  { %vm2368_vm7 = vcmp.lt.s32.totalorder %v1352_v7, 2 }
 0xd82   :  { %v1002_v9 = vpop.permute.xlu0 %1001 }
 0xd83   :  { %v1004_v10 = vmul.f32 %v1002_v9, %v982_v8  ;;  %v2301_v8 = vld [vmem:[#allocation2 + $0x8] sm:$0xff]  ;;  %v1186_v9 = vld [vmem:[%s2427_s6 + $0x30] sm:$0xff] }
 0xd84   :  { %1205 = vmatpush.msra.mxu2 %v1186_v9  ;;  %1597 = vmatpush.msrb.mxu3 %v1186_v9 }
 0xd85   :  { %1005 = vst.msk [vmem:[#allocation2 + $0x18] sm:$0xf] %vm344_vm12, %v1004_v10  ;;  %1572 = vmatmul.msk.f32.vlgmr.msrb.gmra.mxu0 %vm238_vm0, %v1004_v10  ;;  %1573 = vmatmul.msk.f32.vlgmr.msrb.gmra.mxu1 %vm238_vm0, %v1004_v10 }
 0xd86   :  { %1006 = vst.msk [vmem:[#allocation2 + $0x4] sm:$0xf] %vm346_vm13, %v1004_v10  ;;  %v1185_v10 = vld [vmem:[%s2427_s6 + $0x28] sm:$0xff] }
 0xd87   :  { %1206 = vmatpush.msra.mxu2 %v1185_v10  ;;  %1598 = vmatpush.msrb.mxu3 %v1185_v10 }
 0xe02   :  { %v1047_v13 = vpop.f32.mrf.mxu1  ;;  %v1027_v21 = vpop.f32.mrf.mxu0 }
 0xe03   :  { %v1053_v14 = vrot.slane %v1047_v13, 4  ;;  %v1052_v23 = vrot.slane %v1027_v21, 4  ;;  %v2311_v13 = vld [vmem:[#allocation2 + $0x10] sm:$0xff] }
 0xe04   :  { %v1182_v21 = vld [vmem:[%s2427_s6 + $0x10] sm:$0xff] }
 0xe05   :  { %v1057_v17 = vadd.f32 %v1053_v14, %v2243_v46  ;;  %v1056_v25 = vadd.f32 %v1052_v23, %v2249_v28  ;;  %v1181_v23 = vld [vmem:[%s2427_s6 + $0x8] sm:$0xff] }
 0xe07   :  { %1714 = vtanh.f32 %v1057_v17  ;;  %v1574_v57 = vmul.f32 -1.442695, %v1056_v25  ;;  %v1575_v6 = vmul.f32 -1.442695, %v1057_v17  ;;  %v1184_v17 = vld [vmem:[%s2427_s6 + $0x20] sm:$0xff] }
 0xe08   :  { %1207 = vmatpush.msra.mxu2 %v1184_v17  ;;  %1599 = vmatpush.msrb.mxu3 %v1184_v17  ;;  %v1180_v25 = vld [vmem:[%s2427_s6] sm:$0xff] }
 0xe09   :  { %1716 = vpow2.f32 %v1574_v57  ;;  %v1629_v57 = vld [vmem:[%s2426_s5] ss:$0 sm:$0xff] }
 0xe0d   :  { %v1715_v55 = vpop.eup %1714 }
 0xe0e   :  { %1102 = vrot.lane.b32.xlu1 %v1715_v55, %s1807_s25  ;;  %v1183_v55 = vld [vmem:[%s2427_s6 + $0x18] sm:$0xff]  ;;  %s1808_s6 = smov 126  }
 0xe0f   :  { %v1717_v19 = vpop.eup %1716  ;;  %1208 = vmatpush.msra.mxu2 %v1183_v55  ;;  %1600 = vmatpush.msrb.mxu3 %v1183_v55 }
 0xe10   :  { %v1064_v11 = vadd.f32 1.0, %v1717_v19 }
 0xe11   :  { %1209 = vmatpush.msra.mxu2 %v1182_v21  ;;  %1601 = vmatpush.msrb.mxu3 %v1182_v21 }
 0xe12   :  { %1718 = vrcp.f32 %v1064_v11  ;;  %v1077_v34 = vand.u32 2147483648, %v1064_v11  ;;  %vm1071_vm13 = vweird.f32 %v1064_v11  ;;  %v1075_v35 = vand.u32 2147483647, %v1064_v11 }
 0xe13   :  { %1210 = vmatpush.msra.mxu2 %v1181_v23  ;;  %1602 = vmatpush.msrb.mxu3 %v1181_v23 }
 0xe14   :  { %v1078_v39 = vor.u32 1.1754944e-38, %v1077_v34  ;;  %vm1076_vm2 = vcmp.eq.f32.partialorder %v1075_v35, 8.507059e+37 }
 0xe15   :  { %1211 = vmatpush.msra.mxu2 %v1180_v25  ;;  %1603 = vmatpush.msrb.mxu3 %v1180_v25 }
 0xe18   :  { %v1719_v15 = vpop.eup %1718 }
 0xe19   :  { %v1067_v18 = vmul.f32 %v1719_v15, %v1064_v11  ;;  %vm1072_vm12 = vweird.f32 %v1719_v15 }
 0xe1a   :  { %vm1073_vm1 = vmor %vm1071_vm13, %vm1072_vm12  ;;  %vm1520_vm12 = vcmask 1043456   ;;  %vm1523_vm13 = vcmask 523268  }
 0xe1b   :  { %v1068_v20 = vsub.f32 1.0, %v1067_v18 }
 0xe1d   :  { %v1069_v22 = vmul.f32 %v1719_v15, %v1068_v20 }
 0xe1f   :  { %v1070_v24 = vadd.f32 %v1719_v15, %v1069_v22 }
 0xe21   :  { %v1074_v38 = vsel %vm1073_vm1, %v1719_v15, %v1070_v24  ;;  %vm1524_vm1 = vmor %vm1523_vm13, %vm1520_vm12 }
 0xe22   :  { %v1079_v43 = vsel %vm1076_vm2, %v1078_v39, %v1074_v38 }
 0xe23   :  { %v1100_v28 = vmul.f32 %v1098_v62, %v1079_v43 }
 0xe80   :  { %v1103_v42 = vpop.permute.xlu1 %1102 }
 0xe81   :  { %v1105_v46 = vmul.f32 %v1103_v42, %v1079_v43 }
 0xe83   :  { %1107 = vrot.lane.b32.xlu2 %v1105_v46, %s1807_s25 }
 0xedd   :  { %v1108_v29 = vpop.permute.xlu2 %1107 }
 0xede   :  { %v1110_v30 = vadd.f32 %v1108_v29, %v1100_v28 }
 0xee0   :  { %1720 = vtanh.f32 %v1110_v30 }
 0xee1   :  { %1722 = vpow2.f32 %v1575_v6 }
 0xee6   :  { %v1721_v31 = vpop.eup %1720 }
 0xee7   :  { %1113 = vrot.lane.b32.xlu0 %v1721_v31, %s1807_s25  ;;  %v1723_v59 = vpop.eup %1722 }
 0xee8   :  { %v1065_v12 = vadd.f32 1.0, %v1723_v59 }
 0xeea   :  { %1724 = vrcp.f32 %v1065_v12  ;;  %v1092_v49 = vand.u32 2147483648, %v1065_v12  ;;  %vm1086_vm4 = vweird.f32 %v1065_v12  ;;  %v1090_v50 = vand.u32 2147483647, %v1065_v12 }
 0xeec   :  { %v1093_v52 = vor.u32 1.1754944e-38, %v1092_v49  ;;  %vm1091_vm6 = vcmp.eq.f32.partialorder %v1090_v50, 8.507059e+37 }
 0xef0   :  { %v1725_v41 = vpop.eup %1724 }
 0xef1   :  { %v1082_v4 = vmul.f32 %v1725_v41, %v1065_v12  ;;  %vm1087_vm3 = vweird.f32 %v1725_v41 }
 0xef2   :  { %vm1088_vm5 = vmor %vm1086_vm4, %vm1087_vm3 }
 0xef3   :  { %v1083_v26 = vsub.f32 1.0, %v1082_v4 }
 0xef5   :  { %v1084_v44 = vmul.f32 %v1725_v41, %v1083_v26 }
 0xef7   :  { %v1085_v48 = vadd.f32 %v1725_v41, %v1084_v44 }
 0xef9   :  { %v1089_v51 = vsel %vm1088_vm5, %v1725_v41, %v1085_v48 }
 0xefa   :  { %v1094_v53 = vsel %vm1091_vm6, %v1093_v52, %v1089_v51 }
 0xf59   :  { %v1114_v37 = vpop.permute.xlu0 %1113 }
 0xf5a   :  { %v1116_v56 = vmul.f32 %v1114_v37, %v1094_v53 }
 0xf5c   :  { %1117 = vst.msk [vmem:[#allocation2 + $0x18] sm:$0xf0] %vm458_vm10, %v1116_v56  ;;  %vm1225_vm10 = vcmask 31744  }
 0xf5d   :  { %1118 = vst.msk [vmem:[#allocation2 - $0x4] sm:$0xf0] %vm460_vm11, %v1116_v56  ;;  %vm1260_vm11 = vcmask 261120  }
 0xf63   :  { %v2315_v14 = vld [vmem:[#allocation2 + $0x18] sm:$0xff] }
 0xf64   :  { %v2285_v2 = vld [vmem:[#allocation2] sm:$0xff] }
 0xf65   :  { %1576 = vmatmul.msk.f32.vlgmr.msrb.gmra.mxu2 %vm238_vm0, %v2285_v2 }
 0xf6d   :  { %1577 = vmatmul.msk.f32.gmra.mxu2 %vm238_vm0, %v2301_v8 }
 0xf75   :  { %1578 = vmatmul.msk.f32.gmra.mxu2 %vm238_vm0, %v2311_v13 }
 0xf7d   :  { %1579 = vmatmul.msk.f32.gmra.mxu2 %vm238_vm0, %v2315_v14 }
 0xfe8   :  { %v1164_v19 = vpop.f32.mrf.mxu2 }
 0xfe9   :  { %v1165_v11 = vadd.f32 %v1629_v57, %v1164_v19 }
 0xfeb   :  { %1726 = vtanh.f32 %v1165_v11  ;;  %v1351_v11 = vadd.s32 24, %v2365_v5 }
 0xff0   :  { %v1167_v15 = vpop.f32.mrf.mxu2 }
 0xff1   :  { %v1727_v18 = vpop.eup %1726  ;;  %v1168_v20 = vadd.f32 %v1629_v57, %v1167_v15 }
 0xff2   :  { %1212 = vmatmul.f32.vlgmr.msra.gmra.mxu2 %v1727_v18  ;;  %v1355_v18 = vand.u32 3, %v1351_v11 }
 0xff3   :  { %1728 = vtanh.f32 %v1168_v20 }
 0xff4   :  { %vm2388_vm9 = vcmp.lt.s32.totalorder %v1355_v18, 2 }
 0xff8   :  { %v1170_v22 = vpop.f32.mrf.mxu2 }
 0xff9   :  { %v1729_v24 = vpop.eup %1728  ;;  %v1171_v34 = vadd.f32 %v1629_v57, %v1170_v22 }
 0xffa   :  { %1215 = vmatmul.f32.vlgmr.msrb.gmra.mxu3 %v1729_v24  ;;  %v1349_v24 = vadd.s32 8, %v2365_v5 }
 0xffb   :  { %1730 = vtanh.f32 %v1171_v34 }
0x1000   :  { %v1173_v35 = vpop.f32.mrf.mxu2 }
0x1001   :  { %v1731_v38 = vpop.eup %1730  ;;  %v1174_v39 = vadd.f32 %v1629_v57, %v1173_v35  ;;  %v1354_v57 = vand.u32 3, %v1350_v54  ;;  %v1353_v35 = vand.u32 3, %v1349_v24 }
0x1002   :  { %1218 = vmatmul.f32.gmra.mxu3 %v1731_v38 }
0x1003   :  { %1732 = vtanh.f32 %v1174_v39  ;;  %vm2378_vm8 = vcmp.lt.s32.totalorder %v1354_v57, 2  ;;  %vm1357_vm14 = vcmp.lt.s32.totalorder %v1353_v35, 2 }
0x1009   :  { %v1733_v42 = vpop.eup %1732 }
0x100a   :  { %1221 = vmatmul.f32.gmra.mxu3 %v1733_v42  ;;  %v1810_v42 = vmov 3  }
0x1075   :  { %v1213_v47 = vpop.f32.mrf.mxu2 }
0x1076   :  { %v1226_v62 = vsel %vm1225_vm10, %v1213_v47, -inf }
0x107d   :  { %v1216_v43 = vpop.f32.mrf.mxu3 }
0x107e   :  { %v1227_v16 = vsel %vm1225_vm10, %v1216_v43, -inf }
0x107f   :  { %v1230_v30 = vmax.f32 %v1226_v62, %v1227_v16 }
0x1085   :  { %v1219_v46 = vpop.f32.mrf.mxu3 }
0x1086   :  { %v1228_v28 = vsel %vm1225_vm10, %v1219_v46, -inf }
0x108d   :  { %v1222_v1 = vpop.f32.mrf.mxu3 }
0x108e   :  { %v1229_v29 = vsel %vm1225_vm10, %v1222_v1, -inf }
0x108f   :  { %v1231_v31 = vmax.f32 %v1228_v28, %v1229_v29 }
0x1091   :  { %v1232_v6 = vmax.f32 %v1230_v30, %v1231_v31 }
0x1093   :  { %1233 = vmax.xlane.f32.xlu1 %v1232_v6 }
0x1106   :  { %v1234_v59 = vpop.xlane.xlu1 %1233 }
0x1107   :  { %v1235_v12 = vrot.slane %v1234_v59, 4 }
0x1109   :  { %v1236_v27 = vmax.f32 %v1234_v59, %v1235_v12 }
0x110b   :  { %v1237_v32 = vrot.slane %v1236_v27, 2 }
0x110d   :  { %v1238_v33 = vmax.f32 %v1236_v27, %v1237_v32 }
0x110f   :  { %v1239_v36 = vrot.slane %v1238_v33, 1 }
0x1111   :  { %v1240_v40 = vmax.f32 %v1238_v33, %v1239_v36 }
0x1113   :  { %1604 = vpush %v1240_v40 }
0x1144   :  { %s1605_s5 = spop %1604 }
0x1145   :  { %v1242_v41 = vstv %s1605_s5 }
0x1146   :  { %v1245_v4 = vsub.f32 %v1219_v46, %v1242_v41  ;;  %v1246_v26 = vsub.f32 %v1222_v1, %v1242_v41  ;;  %v1244_v48 = vsub.f32 %v1216_v43, %v1242_v41  ;;  %v1243_v50 = vsub.f32 %v1213_v47, %v1242_v41 }
0x1148   :  { %v1251_v44 = vmul.f32 1.442695, %v1245_v4  ;;  %v1253_v49 = vmul.f32 1.442695, %v1246_v26  ;;  %v1249_v51 = vmul.f32 1.442695, %v1244_v48 }
0x1149   :  { %v1247_v52 = vmul.f32 1.442695, %v1243_v50 }
0x114a   :  { %1734 = vpow2.f32 %v1251_v44 }
0x114b   :  { %1736 = vpow2.f32 %v1253_v49 }
0x114c   :  { %1738 = vpow2.f32 %v1249_v51 }
0x114d   :  { %1740 = vpow2.f32 %v1247_v52 }
0x1150   :  { %v1735_v53 = vpop.eup %1734 }
0x1151   :  { %v1737_v37 = vpop.eup %1736  ;;  %1369 = vrot.lane.b32.xlu0 %v1735_v53, %s1808_s6 }
0x1152   :  { %1371 = vrot.lane.b32.xlu2 %v1737_v37, %s1808_s6  ;;  %1285 = vmatpush.msra.mxu0 %v1737_v37  ;;  %v1739_v56 = vpop.eup %1738 }
0x1153   :  { %1317 = vmatpush.msra.mxu1 %v1737_v37  ;;  %v1741_v58 = vpop.eup %1740 }
0x1154   :  { %1286 = vmatpush.msra.mxu0 %v1735_v53 }
0x1155   :  { %1318 = vmatpush.msra.mxu1 %v1735_v53 }
0x1156   :  { %1287 = vmatpush.msra.mxu0 %v1739_v56 }
0x1157   :  { %1319 = vmatpush.msra.mxu1 %v1739_v56 }
0x1158   :  { %1288 = vmatpush.msra.mxu0 %v1741_v58 }
0x1159   :  { %1320 = vmatpush.msra.mxu1 %v1741_v58  ;;  %1580 = vmatmul.msk.f32.vlgmr.msra.gmra.mxu0 %vm1260_vm11, %v1256_v0 }
0x115a   :  { %1367 = vrot.lane.b32.xlu2 %v1739_v56, %s1808_s6  ;;  %1365 = vrot.lane.b32.xlu0 %v1741_v58, %s1808_s6 }
0x115b   :  { %1584 = vmatmul.msk.f32.vlgmr.msra.gmra.mxu1 %vm1260_vm11, %v2360_v3 }
0x1161   :  { %1581 = vmatmul.msk.f32.gmra.mxu0 %vm1260_vm11, %v1257_v60 }
0x1169   :  { %1582 = vmatmul.msk.f32.gmra.mxu0 %vm1260_vm11, %v1258_v61 }
0x1171   :  { %1583 = vmatmul.msk.f32.gmra.mxu0 %vm1260_vm11, %v1259_v63 }
0x11ac   :  { %v1372_v20 = vpop.permute.xlu2 %1371 }
0x11ad   :  { %v1380_v34 = vsel %vm2388_vm9, %v1737_v37, %v1372_v20 }
0x11b4   :  { %v1368_v38 = vpop.permute.xlu2 %1367 }
0x11b5   :  { %v1378_v39 = vsel %vm1357_vm14, %v1739_v56, %v1368_v38 }
0x11c3   :  { %v1370_v45 = vpop.permute.xlu0 %1369 }
0x11c4   :  { %v1379_v15 = vsel %vm2378_vm8, %v1735_v53, %v1370_v45 }
0x11cc   :  { %v1366_v10 = vpop.permute.xlu0 %1365 }
0x11cd   :  { %v1377_v17 = vsel %vm2368_vm7, %v1741_v58, %v1366_v10 }
0x11ce   :  { %1413 = vperm.xlu1 %1621, %v1377_v17  }
0x11d6   :  { %v1290_v55 = vpop.f32.mrf.mxu0 }
0x11d8   :  { %v1322_v16 = vpop.f32.mrf.mxu1 }
0x11d9   :  { %1742 = vrcp.f32 %v1322_v16 }
0x11de   :  { %v1293_v21 = vpop.f32.mrf.mxu0 }
0x11df   :  { %v1743_v31 = vpop.eup %1742 }
0x11e6   :  { %v1296_v23 = vpop.f32.mrf.mxu0 }
0x11e7   :  { %1389 = vrot.lane.b32.xlu0 %v1296_v23, %s1809_s7 }
0x11ee   :  { %v1299_v25 = vpop.f32.mrf.mxu0 }
0x11ef   :  { %1385 = vrot.lane.b32.xlu0 %v1290_v55, %s1809_s7  ;;  %1391 = vrot.lane.b32.xlu2 %v1299_v25, %s1809_s7 }
0x11f0   :  { %1337 = vmatpush.msrb.mxu1 %v1299_v25 }
0x11f2   :  { %1338 = vmatpush.msrb.mxu1 %v1296_v23 }
0x11f4   :  { %1339 = vmatpush.msrb.mxu1 %v1293_v21 }
0x11f6   :  { %1340 = vmatpush.msrb.mxu1 %v1290_v55 }
0x11f7   :  { %1585 = vmatmul.msk.f32.vlgmr.msrb.gmra.mxu1 %vm1260_vm11, %v2360_v3  ;;  %1423 = vperm.xlu0 %1626, %v1379_v15  }
0x11f8   :  { %1387 = vrot.lane.b32.xlu2 %v1293_v21, %s1809_s7 }
0x11ff   :  { %1627 = vset.pattern.permute.xlu0 %v1810_v42 }
0x1200   :  { %1428 = vperm.xlu2 %1625, %v1380_v34  }
0x1208   :  { %1418 = vperm.xlu2 %1625, %v1378_v39  }
0x1210   :  { %1628 = vset.pattern.permute.xlu2 %v1810_v42 }
0x1240   :  { %v1414_v33 = vpop.permute.xlu1 %1413 }
0x1241   :  { %v1431_v40 = vmul.f32 %v1414_v33, %v2285_v2 }
0x1249   :  { %v1392_v43 = vpop.permute.xlu2 %1391 }
0x124a   :  { %v1400_v30 = vsel %vm2388_vm9, %v1299_v25, %v1392_v43 }
0x1252   :  { %v1388_v46 = vpop.permute.xlu2 %1387 }
0x1253   :  { %v1398_v47 = vsel %vm1357_vm14, %v1293_v21, %v1388_v46 }
0x1254   :  { %1468 = vperm.xlu2 %1628, %v1398_v47  }
0x1259   :  { %v1390_v1 = vpop.permute.xlu0 %1389 }
0x125a   :  { %v1429_v62 = vpop.permute.xlu2 %1428  ;;  %v1399_v28 = vsel %vm2378_vm8, %v1296_v23, %v1390_v1 }
0x125b   :  { %v1434_v29 = vmul.f32 %v1429_v62, %v2315_v14  ;;  %1473 = vperm.xlu0 %1627, %v1399_v28  }
0x125c   :  { %1478 = vperm.xlu2 %1628, %v1400_v30  }
0x125d   :  { %1447 = vmatpush.msra.mxu1 %v1434_v29 }
0x1261   :  { %v1386_v6 = vpop.permute.xlu0 %1385 }
0x1262   :  { %v1397_v59 = vsel %vm2368_vm7, %v1290_v55, %v1386_v6  ;;  %v1419_v12 = vpop.permute.xlu2 %1418 }
0x1263   :  { %1402 = vrot.lane.b32.xlu0 %v1743_v31, %s1808_s6  ;;  %v1432_v36 = vmul.f32 %v1419_v12, %v2301_v8 }
0x1264   :  { %1463 = vperm.xlu2 %1628, %v1397_v59  }
0x1269   :  { %v1424_v27 = vpop.permute.xlu0 %1423 }
0x126a   :  { %v1433_v32 = vmul.f32 %v1424_v27, %v2311_v13 }
0x126c   :  { %1448 = vmatpush.msra.mxu1 %v1433_v32 }
0x126e   :  { %1449 = vmatpush.msra.mxu1 %v1432_v36 }
0x1270   :  { %1450 = vmatpush.msra.mxu1 %v1431_v40 }
0x1271   :  { %1586 = vmatmul.msk.f32.vlgmr.msra.gmra.mxu1 %vm1260_vm11, %v2360_v3 }
0x1274   :  { %v1342_v41 = vpop.f32.mrf.mxu1 }
0x1275   :  { %1744 = vrcp.f32 %v1342_v41 }
0x127b   :  { %v1745_v4 = vpop.eup %1744 }
0x127c   :  { %1407 = vrot.lane.b32.xlu1 %v1745_v4, %s1809_s7 }
0x12ae   :  { %v1469_v26 = vpop.permute.xlu2 %1468 }
0x12af   :  { %v1482_v52 = vmul.f32 %v1469_v26, %v2301_v8 }
0x12b6   :  { %v1479_v44 = vpop.permute.xlu2 %1478 }
0x12b7   :  { %v1484_v48 = vmul.f32 %v1479_v44, %v2315_v14 }
0x12b9   :  { %1497 = vmatpush.msrb.mxu1 %v1484_v48 }
0x12be   :  { %v1464_v51 = vpop.permute.xlu2 %1463 }
0x12bf   :  { %v1481_v53 = vmul.f32 %v1464_v51, %v2285_v2 }
0x12cd   :  { %v1474_v49 = vpop.permute.xlu0 %1473 }
0x12ce   :  { %v1483_v50 = vmul.f32 %v1474_v49, %v2311_v13 }
0x12d0   :  { %1498 = vmatpush.msrb.mxu1 %v1483_v50 }
0x12d2   :  { %1499 = vmatpush.msrb.mxu1 %v1482_v52 }
0x12d4   :  { %1500 = vmatpush.msrb.mxu1 %v1481_v53 }
0x12d5   :  { %v1403_v37 = vpop.permute.xlu0 %1402  ;;  %1587 = vmatmul.msk.f32.vlgmr.msrb.gmra.mxu1 %vm1260_vm11, %v2360_v3 }
0x12d6   :  { %v1405_v56 = vsel %vm1360_vm15, %v1743_v31, %v1403_v37 }
0x12d7   :  { %1457 = vperm.xlu1 %1621, %v1405_v56  }
0x12ee   :  { %v1408_v14 = vpop.permute.xlu1 %1407  ;;  %v1452_v13 = vpop.f32.mrf.mxu1 }
0x12ef   :  { %v1410_v0 = vsel %vm1360_vm15, %v1745_v4, %v1408_v14 }
0x12f0   :  { %1507 = vperm.xlu2 %1628, %v1410_v0  }
0x1349   :  { %v1458_v58 = vpop.permute.xlu1 %1457 }
0x134a   :  { %v1508_v60 = vpop.permute.xlu2 %1507  ;;  %v1460_v61 = vmul.f32 %v1458_v58, %v1452_v13 }
0x1352   :  { %v1502_v8 = vpop.f32.mrf.mxu1 }
0x1353   :  { %v1510_v63 = vmul.f32 %v1508_v60, %v1502_v8 }
0x1355   :  { %v1511_v2 = vadd.f32 %v1510_v63, %v1460_v61  ;;  %1513 = vrot.lane.b32.xlu0 %v1510_v63, %s1807_s25 }
0x1357   :  { %v1519_v45 = vrot.slane %v1511_v2, 4 }
0x13c7   :  { %v1514_v5 = vpop.permute.xlu0 %1513 }
0x13c8   :  { %v1516_v3 = vsel %vm238_vm0, %v1460_v61, %v1514_v5 }
0x13c9   :  { %v1521_v7 = vsel %vm1520_vm12, %v1516_v3, %v1519_v45 }
0x13ca   :  { %1525 = vst.msk [vmem:[%s2432_s11] sm:$0xff] %vm1524_vm1, %v1521_v7 }
0x13cb   :  { %1530 = vsyncpa [#allocation4], 1 }
0x13cc   :  { %1531 = vsyncpa [#allocation6], 1 }

</bundles_post_ra>
